<compile_context>
chip_gen: v6e
topology: v6e:2x2x1
jax: 0.10.0
libtpu: 0.0.40
codegen_flags: <defaults>
</compile_context>

<pallas_src>
import functools
import math

import jax
import jax.numpy as jnp
from jax.experimental import pallas as pl
from jax.experimental.pallas import tpu as pltpu


def _encoder_layer_kernel(
    xq_ref,                      # (1, tq, D) f32   query tile of x (kept f32 for residual)
    xkv_ref,                     # (1, S,  D) bf16  full-sequence x (K/V stream)
    wq_ref, bq_ref,              # (D, D) bf16, (1, D) f32
    wk_ref, bk_ref,              # (D, D) bf16, (1, D) f32
    wv_ref, bv_ref,              # (D, D) bf16, (1, D) f32
    wo_ref, bo_ref,              # (H, dh, D) bf16 (head-major), (1, D) f32
    g1_ref, be1_ref,             # (1, D) f32   LayerNorm1 gamma/beta
    w1_ref, b1_ref,              # (D, F) bf16, (1, F) f32
    w2_ref, b2_ref,              # (F, D) bf16, (1, D) f32
    g2_ref, be2_ref,             # (1, D) f32   LayerNorm2 gamma/beta
    o_ref,                       # (1, tq, D)
    k_scr, v_scr,                # VMEM (H, S,  dh) bf16 — cached once per batch
    q_scr,                       # VMEM (H, tq, dh) bf16 — head-major q for this tile
    *,
    num_heads,
):
    f32 = jnp.float32
    bf16 = jnp.bfloat16
    eps = 1e-5

    tq, D = xq_ref.shape[1], xq_ref.shape[2]
    S = xkv_ref.shape[1]
    H = num_heads
    dh = D // H
    scale = 1.0 / math.sqrt(dh)

    # ---- K/V projection: once per batch (q-tile axis is "arbitrary") ----
    @pl.when(pl.program_id(1) == 0)
    def _project_kv():
        x_kv = xkv_ref[0]                                                # (S, D) bf16
        k = (jnp.dot(x_kv, wk_ref[...], preferred_element_type=f32)
             + bk_ref[...]).astype(bf16)                                 # (S, D)
        v = (jnp.dot(x_kv, wv_ref[...], preferred_element_type=f32)
             + bv_ref[...]).astype(bf16)                                 # (S, D)
        for h in range(H):                                               # head-major cache
            k_scr[h] = k[:, h * dh:(h + 1) * dh]
            v_scr[h] = v[:, h * dh:(h + 1) * dh]

    # ---- Q projection for this tile (softmax scale folded in, then one bf16 cast) ----
    x_q = xq_ref[0]                                                      # (tq, D) f32
    q = jnp.dot(x_q.astype(bf16), wq_ref[...], preferred_element_type=f32) + bq_ref[...]
    q = (q * scale).astype(bf16)                                         # (tq, D) bf16
    for h in range(H):
        q_scr[h] = q[:, h * dh:(h + 1) * dh]

    # ---- batched-head scaled-dot-product attention (mask=None, f32 softmax) ----
    qh = q_scr[...]                                                      # (H, tq, dh)
    kh = k_scr[...]                                                      # (H, S,  dh)
    vh = v_scr[...]                                                      # (H, S,  dh)
    s = jnp.einsum('hqd,hkd->hqk', qh, kh, preferred_element_type=f32)   # (H, tq, S)
    m = jnp.max(s, axis=-1, keepdims=True)
    e = jnp.exp(s - m)
    den = jnp.sum(e, axis=-1, keepdims=True)
    p = (e * pl.reciprocal(den, approx=True)).astype(bf16)               # EUP reciprocal
    ctx = jnp.einsum('hqk,hkd->hqd', p, vh, preferred_element_type=f32)  # (H, tq, dh)

    # ---- output projection: per-head batched matmul, accumulated (no concat) ----
    attn_h = jnp.einsum('hqd,hde->hqe', ctx.astype(bf16), wo_ref[...],
                        preferred_element_type=f32)                      # (H, tq, D)
    attn = attn_h[0]
    for h in range(1, H):
        attn = attn + attn_h[h]
    attn = attn + bo_ref[...]                                            # (tq, D) f32

    # ---- residual + LayerNorm1 (f32) ----
    y = x_q + attn
    mu = jnp.mean(y, axis=-1, keepdims=True)
    var = jnp.mean((y - mu) * (y - mu), axis=-1, keepdims=True)
    y = (y - mu) * jax.lax.rsqrt(var + eps) * g1_ref[...] + be1_ref[...]

    # ---- feed-forward: Linear -> ReLU -> Linear ----
    h1 = jnp.dot(y.astype(bf16), w1_ref[...], preferred_element_type=f32) + b1_ref[...]
    h1 = jnp.maximum(h1, 0.0)
    ff = jnp.dot(h1.astype(bf16), w2_ref[...], preferred_element_type=f32) + b2_ref[...]

    # ---- residual + LayerNorm2 (f32) ----
    z = y + ff
    mu2 = jnp.mean(z, axis=-1, keepdims=True)
    var2 = jnp.mean((z - mu2) * (z - mu2), axis=-1, keepdims=True)
    z = (z - mu2) * jax.lax.rsqrt(var2 + eps) * g2_ref[...] + be2_ref[...]

    o_ref[0] = z.astype(o_ref.dtype)


def _pick_q_tile(seq_len, max_tile=256):
    """Largest multiple-of-8 divisor of seq_len not exceeding max_tile (then 512)."""
    if seq_len <= max_tile:
        return seq_len
    for cap in (max_tile, 512):
        for t in range(cap, 7, -8):
            if seq_len % t == 0:
                return t
    # TODO(synk): pad S (with key masking) instead of a degenerate full-length q tile.
    return seq_len


def _default_vmem_limit():
    """~75% of physical VMEM (capped), so v6e gets big tiles and v7x keeps headroom."""
    try:
        cap = pltpu.get_tpu_info().vmem_capacity_bytes
        return int(min(cap * 3 // 4, 100 * 1024 * 1024))
    except Exception:
        return 48 * 1024 * 1024


def encoder_layer(x, params, num_heads):
    B, S, D = x.shape
    F = params['w1'].shape[1]
    dh = D // num_heads
    tq = _pick_q_tile(S)
    n_q = S // tq

    bf16 = jnp.bfloat16
    # cast matmul weights once (halves HBM traffic / VMEM residency); biases & LN stay f32
    w_q = params['w_q'].astype(bf16)
    w_k = params['w_k'].astype(bf16)
    w_v = params['w_v'].astype(bf16)
    w_o = params['w_o'].reshape(num_heads, dh, D).astype(bf16)   # head-major, free in XLA
    w1 = params['w1'].astype(bf16)
    w2 = params['w2'].astype(bf16)
    x_kv = x.astype(bf16)                                         # bf16 K/V stream

    def const_spec(arr):
        # whole-array block, constant block index => fetched once, re-used across the grid
        return pl.BlockSpec(arr.shape, lambda b, i: (0,) * arr.ndim)

    in_specs = [
        pl.BlockSpec((1, tq, D), lambda b, i: (b, i, 0)),   # x (query tile, f32)
        pl.BlockSpec((1, S, D), lambda b, i: (b, 0, 0)),    # x (full sequence, bf16, per-batch)
        const_spec(w_q), const_spec(params['b_q']),
        const_spec(w_k), const_spec(params['b_k']),
        const_spec(w_v), const_spec(params['b_v']),
        const_spec(w_o), const_spec(params['b_o']),
        const_spec(params['g1']), const_spec(params['be1']),
        const_spec(w1), const_spec(params['b1']),
        const_spec(w2), const_spec(params['b2']),
        const_spec(params['g2']), const_spec(params['be2']),
    ]
    out_specs = pl.BlockSpec((1, tq, D), lambda b, i: (b, i, 0))

    scratch_shapes = [
        pltpu.VMEM((num_heads, S, dh), bf16),    # K cache (head-major)
        pltpu.VMEM((num_heads, S, dh), bf16),    # V cache (head-major)
        pltpu.VMEM((num_heads, tq, dh), bf16),   # head-major Q for the current tile
    ]

    # advisory cost hint (K/V projection counted once per batch now)
    flops = int(B * (2 * S * D * D * 3            # Q,K,V projections
                     + 4 * num_heads * S * S * dh  # scores + context
                     + 2 * S * D * D               # output projection
                     + 4 * S * D * F))             # feed-forward
    transcendentals = int(B * (num_heads * S * S + num_heads * S + 2 * S))
    bytes_accessed = int(
        B * S * D * (4 + 2 + 4)                                        # xq f32 + xkv bf16 + out
        + (w_q.size + w_k.size + w_v.size + w_o.size + w1.size + w2.size) * 2
        + (4 * D + 4 * D + D + F) * 4)                                 # biases + LN params

    kernel = functools.partial(_encoder_layer_kernel, num_heads=num_heads)

    return pl.pallas_call(
        kernel,
        out_shape=jax.ShapeDtypeStruct((B, S, D), x.dtype),
        grid_spec=pltpu.PrefetchScalarGridSpec(
            num_scalar_prefetch=0,
            grid=(B, n_q),
            in_specs=in_specs,
            out_specs=out_specs,
            scratch_shapes=scratch_shapes,
        ),
        compiler_params=pltpu.CompilerParams(
            # batch axis parallel (keeps both v7x TCs busy); q-tile axis must be
            # "arbitrary" so the per-batch K/V scratch is reused across tiles.
            dimension_semantics=("parallel", "arbitrary"),
            vmem_limit_bytes=_default_vmem_limit(),
        ),
        cost_estimate=pl.CostEstimate(
            flops=flops,
            transcendentals=transcendentals,
            bytes_accessed=bytes_accessed,
        ),
    )(
        x, x_kv,
        w_q, params['b_q'],
        w_k, params['b_k'],
        w_v, params['b_v'],
        w_o, params['b_o'],
        params['g1'], params['be1'],
        w1, params['b1'],
        w2, params['b2'],
        params['g2'], params['be2'],
    )


def init_params(key, d_model, num_heads, d_ff):
    del num_heads  # head split happens in-kernel (dh = d_model // num_heads)
    ks = jax.random.split(key, 6)
    std = 0.02

    def lin(k, shape):
        return jax.random.normal(k, shape, jnp.float32) * std

    zeros_d = jnp.zeros((1, d_model), jnp.float32)
    return {
        'w_q': lin(ks[0], (d_model, d_model)), 'b_q': zeros_d,
        'w_k': lin(ks[1], (d_model, d_model)), 'b_k': zeros_d,
        'w_v': lin(ks[2], (d_model, d_model)), 'b_v': zeros_d,
        'w_o': lin(ks[3], (d_model, d_model)), 'b_o': zeros_d,
        'g1': jnp.ones((1, d_model), jnp.float32), 'be1': zeros_d,
        'w1': lin(ks[4], (d_model, d_ff)), 'b1': jnp.zeros((1, d_ff), jnp.float32),
        'w2': lin(ks[5], (d_ff, d_model)), 'b2': zeros_d,
        'g2': jnp.ones((1, d_model), jnp.float32), 'be2': zeros_d,
    }


if __name__ == "__main__":
    B, S, D, H = 2, 8, 32, 4
    F = 4 * D  # FeedForward hidden size

    key = jax.random.PRNGKey(0)
    kx, kp = jax.random.split(key)
    x = jax.random.normal(kx, (B, S, D), jnp.float32)
    params = init_params(kp, D, H, F)

    out = encoder_layer(x, params, H)
    jax.block_until_ready(out)
    assert out.shape == (B, S, D)
    assert bool(jnp.all(jnp.isfinite(out)))
    print("KERNEL_OK")
</pallas_src>

<mosaic_0001>
module attributes {stable_mosaic.version = 11 : i64} {
  func.func @_encoder_layer_kernel(%arg0: i32, %arg1: i32, %arg2: memref<1x8x32xf32, #tpu.memory_space<vmem>>, %arg3: memref<1x8x32xbf16, #tpu.memory_space<vmem>>, %arg4: memref<32x32xbf16, #tpu.memory_space<vmem>>, %arg5: memref<1x32xf32, #tpu.memory_space<vmem>>, %arg6: memref<32x32xbf16, #tpu.memory_space<vmem>>, %arg7: memref<1x32xf32, #tpu.memory_space<vmem>>, %arg8: memref<32x32xbf16, #tpu.memory_space<vmem>>, %arg9: memref<1x32xf32, #tpu.memory_space<vmem>>, %arg10: memref<4x8x32xbf16, #tpu.memory_space<vmem>>, %arg11: memref<1x32xf32, #tpu.memory_space<vmem>>, %arg12: memref<1x32xf32, #tpu.memory_space<vmem>>, %arg13: memref<1x32xf32, #tpu.memory_space<vmem>>, %arg14: memref<32x128xbf16, #tpu.memory_space<vmem>>, %arg15: memref<1x128xf32, #tpu.memory_space<vmem>>, %arg16: memref<128x32xbf16, #tpu.memory_space<vmem>>, %arg17: memref<1x32xf32, #tpu.memory_space<vmem>>, %arg18: memref<1x32xf32, #tpu.memory_space<vmem>>, %arg19: memref<1x32xf32, #tpu.memory_space<vmem>>, %arg20: memref<1x8x32xf32, #tpu.memory_space<vmem>>, %arg21: memref<4x8x8xbf16, #tpu.memory_space<vmem>>, %arg22: memref<4x8x8xbf16, #tpu.memory_space<vmem>>, %arg23: memref<4x8x8xbf16, #tpu.memory_space<vmem>>) attributes {dimension_semantics = [#tpu.dimension_semantics<parallel>, #tpu.dimension_semantics<arbitrary>], iteration_bounds = array<i64: 2, 1>, scalar_prefetch = 0 : i64, scratch_operands = 3 : i64, tpu.core_type = #tpu.core_type<tc>, window_params = [{transform_indices = @transform_0, window_bounds = array<i64: 1, 8, 32>}, {transform_indices = @transform_1, window_bounds = array<i64: 1, 8, 32>}, {pipeline_mode = #tpu.pipeline_mode<synchronous>, transform_indices = @transform_2, window_bounds = array<i64: 32, 32>}, {pipeline_mode = #tpu.pipeline_mode<synchronous>, transform_indices = @transform_3, window_bounds = array<i64: 1, 32>}, {pipeline_mode = #tpu.pipeline_mode<synchronous>, transform_indices = @transform_4, window_bounds = array<i64: 32, 32>}, {pipeline_mode = #tpu.pipeline_mode<synchronous>, transform_indices = @transform_5, window_bounds = array<i64: 1, 32>}, {pipeline_mode = #tpu.pipeline_mode<synchronous>, transform_indices = @transform_6, window_bounds = array<i64: 32, 32>}, {pipeline_mode = #tpu.pipeline_mode<synchronous>, transform_indices = @transform_7, window_bounds = array<i64: 1, 32>}, {pipeline_mode = #tpu.pipeline_mode<synchronous>, transform_indices = @transform_8, window_bounds = array<i64: 4, 8, 32>}, {pipeline_mode = #tpu.pipeline_mode<synchronous>, transform_indices = @transform_9, window_bounds = array<i64: 1, 32>}, {pipeline_mode = #tpu.pipeline_mode<synchronous>, transform_indices = @transform_10, window_bounds = array<i64: 1, 32>}, {pipeline_mode = #tpu.pipeline_mode<synchronous>, transform_indices = @transform_11, window_bounds = array<i64: 1, 32>}, {pipeline_mode = #tpu.pipeline_mode<synchronous>, transform_indices = @transform_12, window_bounds = array<i64: 32, 128>}, {pipeline_mode = #tpu.pipeline_mode<synchronous>, transform_indices = @transform_13, window_bounds = array<i64: 1, 128>}, {pipeline_mode = #tpu.pipeline_mode<synchronous>, transform_indices = @transform_14, window_bounds = array<i64: 128, 32>}, {pipeline_mode = #tpu.pipeline_mode<synchronous>, transform_indices = @transform_15, window_bounds = array<i64: 1, 32>}, {pipeline_mode = #tpu.pipeline_mode<synchronous>, transform_indices = @transform_16, window_bounds = array<i64: 1, 32>}, {pipeline_mode = #tpu.pipeline_mode<synchronous>, transform_indices = @transform_17, window_bounds = array<i64: 1, 32>}, {transform_indices = @transform_18, window_bounds = array<i64: 1, 8, 32>}]} {
    %c0_i32 = arith.constant 0 : i32
    %0 = arith.cmpi eq, %arg1, %c0_i32 : i32
    %1 = arith.extui %0 : i1 to i32
    %c0_i32_0 = arith.constant 0 : i32
    %2 = arith.cmpi ne, %1, %c0_i32_0 : i32
    scf.if %2 {
      %c0_68 = arith.constant 0 : index
      %c0_69 = arith.constant 0 : index
      %c0_70 = arith.constant 0 : index
      %134 = vector.load %arg3[%c0_68, %c0_69, %c0_70] : memref<1x8x32xbf16, #tpu.memory_space<vmem>>, vector<1x8x32xbf16>
      %135 = vector.shape_cast %134 : vector<1x8x32xbf16> to vector<8x32xbf16>
      %c0_71 = arith.constant 0 : index
      %c0_72 = arith.constant 0 : index
      %136 = vector.load %arg6[%c0_71, %c0_72] : memref<32x32xbf16, #tpu.memory_space<vmem>>, vector<32x32xbf16>
      %cst_73 = arith.constant dense<0.000000e+00> : vector<8x32xf32>
      %137 = tpu.matmul %135, %136, %cst_73 {dimension_numbers = #tpu.dot_dimension_numbers<[1], [0], [0], [1], [0, 0, 1, 1], [], []>} : vector<8x32xbf16>, vector<32x32xbf16>, vector<8x32xf32> -> vector<8x32xf32>
      %c0_74 = arith.constant 0 : index
      %c0_75 = arith.constant 0 : index
      %138 = vector.load %arg7[%c0_74, %c0_75] : memref<1x32xf32, #tpu.memory_space<vmem>>, vector<1x32xf32>
      %139 = vector.broadcast %138 : vector<1x32xf32> to vector<8x32xf32>
      %140 = arith.addf %137, %139 : vector<8x32xf32>
      %141 = arith.truncf %140 : vector<8x32xf32> to vector<8x32xbf16>
      %c0_76 = arith.constant 0 : index
      %c0_77 = arith.constant 0 : index
      %142 = vector.load %arg8[%c0_76, %c0_77] : memref<32x32xbf16, #tpu.memory_space<vmem>>, vector<32x32xbf16>
      %cst_78 = arith.constant dense<0.000000e+00> : vector<8x32xf32>
      %143 = tpu.matmul %135, %142, %cst_78 {dimension_numbers = #tpu.dot_dimension_numbers<[1], [0], [0], [1], [0, 0, 1, 1], [], []>} : vector<8x32xbf16>, vector<32x32xbf16>, vector<8x32xf32> -> vector<8x32xf32>
      %c0_79 = arith.constant 0 : index
      %c0_80 = arith.constant 0 : index
      %144 = vector.load %arg9[%c0_79, %c0_80] : memref<1x32xf32, #tpu.memory_space<vmem>>, vector<1x32xf32>
      %145 = vector.broadcast %144 : vector<1x32xf32> to vector<8x32xf32>
      %146 = arith.addf %143, %145 : vector<8x32xf32>
      %147 = arith.truncf %146 : vector<8x32xf32> to vector<8x32xbf16>
      %148 = vector.extract_strided_slice %141 {offsets = [0, 0], sizes = [8, 8], strides = [1, 1]} : vector<8x32xbf16> to vector<8x8xbf16>
      %c0_81 = arith.constant 0 : index
      %c0_82 = arith.constant 0 : index
      %c0_83 = arith.constant 0 : index
      %149 = vector.load %arg21[%c0_81, %c0_82, %c0_83] : memref<4x8x8xbf16, #tpu.memory_space<vmem>>, vector<1x8x8xbf16>
      %150 = vector.shape_cast %149 : vector<1x8x8xbf16> to vector<8x8xbf16>
      %151 = vector.shape_cast %148 : vector<8x8xbf16> to vector<1x8x8xbf16>
      tpu.vector_store %arg21[%c0_81, %c0_82, %c0_83], %151 {strides = array<i32>} : memref<4x8x8xbf16, #tpu.memory_space<vmem>>, vector<1x8x8xbf16>,
      %152 = vector.extract_strided_slice %147 {offsets = [0, 0], sizes = [8, 8], strides = [1, 1]} : vector<8x32xbf16> to vector<8x8xbf16>
      %c0_84 = arith.constant 0 : index
      %c0_85 = arith.constant 0 : index
      %c0_86 = arith.constant 0 : index
      %153 = vector.load %arg22[%c0_84, %c0_85, %c0_86] : memref<4x8x8xbf16, #tpu.memory_space<vmem>>, vector<1x8x8xbf16>
      %154 = vector.shape_cast %153 : vector<1x8x8xbf16> to vector<8x8xbf16>
      %155 = vector.shape_cast %152 : vector<8x8xbf16> to vector<1x8x8xbf16>
      tpu.vector_store %arg22[%c0_84, %c0_85, %c0_86], %155 {strides = array<i32>} : memref<4x8x8xbf16, #tpu.memory_space<vmem>>, vector<1x8x8xbf16>,
      %156 = vector.extract_strided_slice %141 {offsets = [0, 8], sizes = [8, 8], strides = [1, 1]} : vector<8x32xbf16> to vector<8x8xbf16>
      %c1_87 = arith.constant 1 : index
      %c0_88 = arith.constant 0 : index
      %c0_89 = arith.constant 0 : index
      %157 = vector.load %arg21[%c1_87, %c0_88, %c0_89] : memref<4x8x8xbf16, #tpu.memory_space<vmem>>, vector<1x8x8xbf16>
      %158 = vector.shape_cast %157 : vector<1x8x8xbf16> to vector<8x8xbf16>
      %159 = vector.shape_cast %156 : vector<8x8xbf16> to vector<1x8x8xbf16>
      tpu.vector_store %arg21[%c1_87, %c0_88, %c0_89], %159 {strides = array<i32>} : memref<4x8x8xbf16, #tpu.memory_space<vmem>>, vector<1x8x8xbf16>,
      %160 = vector.extract_strided_slice %147 {offsets = [0, 8], sizes = [8, 8], strides = [1, 1]} : vector<8x32xbf16> to vector<8x8xbf16>
      %c1_90 = arith.constant 1 : index
      %c0_91 = arith.constant 0 : index
      %c0_92 = arith.constant 0 : index
      %161 = vector.load %arg22[%c1_90, %c0_91, %c0_92] : memref<4x8x8xbf16, #tpu.memory_space<vmem>>, vector<1x8x8xbf16>
      %162 = vector.shape_cast %161 : vector<1x8x8xbf16> to vector<8x8xbf16>
      %163 = vector.shape_cast %160 : vector<8x8xbf16> to vector<1x8x8xbf16>
      tpu.vector_store %arg22[%c1_90, %c0_91, %c0_92], %163 {strides = array<i32>} : memref<4x8x8xbf16, #tpu.memory_space<vmem>>, vector<1x8x8xbf16>,
      %164 = vector.extract_strided_slice %141 {offsets = [0, 16], sizes = [8, 8], strides = [1, 1]} : vector<8x32xbf16> to vector<8x8xbf16>
      %c2_93 = arith.constant 2 : index
      %c0_94 = arith.constant 0 : index
      %c0_95 = arith.constant 0 : index
      %165 = vector.load %arg21[%c2_93, %c0_94, %c0_95] : memref<4x8x8xbf16, #tpu.memory_space<vmem>>, vector<1x8x8xbf16>
      %166 = vector.shape_cast %165 : vector<1x8x8xbf16> to vector<8x8xbf16>
      %167 = vector.shape_cast %164 : vector<8x8xbf16> to vector<1x8x8xbf16>
      tpu.vector_store %arg21[%c2_93, %c0_94, %c0_95], %167 {strides = array<i32>} : memref<4x8x8xbf16, #tpu.memory_space<vmem>>, vector<1x8x8xbf16>,
      %168 = vector.extract_strided_slice %147 {offsets = [0, 16], sizes = [8, 8], strides = [1, 1]} : vector<8x32xbf16> to vector<8x8xbf16>
      %c2_96 = arith.constant 2 : index
      %c0_97 = arith.constant 0 : index
      %c0_98 = arith.constant 0 : index
      %169 = vector.load %arg22[%c2_96, %c0_97, %c0_98] : memref<4x8x8xbf16, #tpu.memory_space<vmem>>, vector<1x8x8xbf16>
      %170 = vector.shape_cast %169 : vector<1x8x8xbf16> to vector<8x8xbf16>
      %171 = vector.shape_cast %168 : vector<8x8xbf16> to vector<1x8x8xbf16>
      tpu.vector_store %arg22[%c2_96, %c0_97, %c0_98], %171 {strides = array<i32>} : memref<4x8x8xbf16, #tpu.memory_space<vmem>>, vector<1x8x8xbf16>,
      %172 = vector.extract_strided_slice %141 {offsets = [0, 24], sizes = [8, 8], strides = [1, 1]} : vector<8x32xbf16> to vector<8x8xbf16>
      %c3_99 = arith.constant 3 : index
      %c0_100 = arith.constant 0 : index
      %c0_101 = arith.constant 0 : index
      %173 = vector.load %arg21[%c3_99, %c0_100, %c0_101] : memref<4x8x8xbf16, #tpu.memory_space<vmem>>, vector<1x8x8xbf16>
      %174 = vector.shape_cast %173 : vector<1x8x8xbf16> to vector<8x8xbf16>
      %175 = vector.shape_cast %172 : vector<8x8xbf16> to vector<1x8x8xbf16>
      tpu.vector_store %arg21[%c3_99, %c0_100, %c0_101], %175 {strides = array<i32>} : memref<4x8x8xbf16, #tpu.memory_space<vmem>>, vector<1x8x8xbf16>,
      %176 = vector.extract_strided_slice %147 {offsets = [0, 24], sizes = [8, 8], strides = [1, 1]} : vector<8x32xbf16> to vector<8x8xbf16>
      %c3_102 = arith.constant 3 : index
      %c0_103 = arith.constant 0 : index
      %c0_104 = arith.constant 0 : index
      %177 = vector.load %arg22[%c3_102, %c0_103, %c0_104] : memref<4x8x8xbf16, #tpu.memory_space<vmem>>, vector<1x8x8xbf16>
      %178 = vector.shape_cast %177 : vector<1x8x8xbf16> to vector<8x8xbf16>
      %179 = vector.shape_cast %176 : vector<8x8xbf16> to vector<1x8x8xbf16>
      tpu.vector_store %arg22[%c3_102, %c0_103, %c0_104], %179 {strides = array<i32>} : memref<4x8x8xbf16, #tpu.memory_space<vmem>>, vector<1x8x8xbf16>,
    } else {
    }
    %c0 = arith.constant 0 : index
    %c0_1 = arith.constant 0 : index
    %c0_2 = arith.constant 0 : index
    %3 = vector.load %arg2[%c0, %c0_1, %c0_2] : memref<1x8x32xf32, #tpu.memory_space<vmem>>, vector<1x8x32xf32>
    %4 = vector.shape_cast %3 : vector<1x8x32xf32> to vector<8x32xf32>
    %5 = arith.truncf %4 : vector<8x32xf32> to vector<8x32xbf16>
    %c0_3 = arith.constant 0 : index
    %c0_4 = arith.constant 0 : index
    %6 = vector.load %arg4[%c0_3, %c0_4] : memref<32x32xbf16, #tpu.memory_space<vmem>>, vector<32x32xbf16>
    %cst = arith.constant dense<0.000000e+00> : vector<8x32xf32>
    %7 = tpu.matmul %5, %6, %cst {dimension_numbers = #tpu.dot_dimension_numbers<[1], [0], [0], [1], [0, 0, 1, 1], [], []>} : vector<8x32xbf16>, vector<32x32xbf16>, vector<8x32xf32> -> vector<8x32xf32>
    %c0_5 = arith.constant 0 : index
    %c0_6 = arith.constant 0 : index
    %8 = vector.load %arg5[%c0_5, %c0_6] : memref<1x32xf32, #tpu.memory_space<vmem>>, vector<1x32xf32>
    %9 = vector.broadcast %8 : vector<1x32xf32> to vector<8x32xf32>
    %10 = arith.addf %7, %9 : vector<8x32xf32>
    %cst_7 = arith.constant 0.353553385 : f32
    %11 = vector.broadcast %cst_7 : f32 to vector<8x32xf32>
    %12 = arith.mulf %10, %11 : vector<8x32xf32>
    %13 = arith.truncf %12 : vector<8x32xf32> to vector<8x32xbf16>
    %14 = vector.extract_strided_slice %13 {offsets = [0, 0], sizes = [8, 8], strides = [1, 1]} : vector<8x32xbf16> to vector<8x8xbf16>
    %c0_8 = arith.constant 0 : index
    %c0_9 = arith.constant 0 : index
    %c0_10 = arith.constant 0 : index
    %15 = vector.load %arg23[%c0_8, %c0_9, %c0_10] : memref<4x8x8xbf16, #tpu.memory_space<vmem>>, vector<1x8x8xbf16>
    %16 = vector.shape_cast %15 : vector<1x8x8xbf16> to vector<8x8xbf16>
    %17 = vector.shape_cast %14 : vector<8x8xbf16> to vector<1x8x8xbf16>
    tpu.vector_store %arg23[%c0_8, %c0_9, %c0_10], %17 {strides = array<i32>} : memref<4x8x8xbf16, #tpu.memory_space<vmem>>, vector<1x8x8xbf16>,
    %18 = vector.extract_strided_slice %13 {offsets = [0, 8], sizes = [8, 8], strides = [1, 1]} : vector<8x32xbf16> to vector<8x8xbf16>
    %c1 = arith.constant 1 : index
    %c0_11 = arith.constant 0 : index
    %c0_12 = arith.constant 0 : index
    %19 = vector.load %arg23[%c1, %c0_11, %c0_12] : memref<4x8x8xbf16, #tpu.memory_space<vmem>>, vector<1x8x8xbf16>
    %20 = vector.shape_cast %19 : vector<1x8x8xbf16> to vector<8x8xbf16>
    %21 = vector.shape_cast %18 : vector<8x8xbf16> to vector<1x8x8xbf16>
    tpu.vector_store %arg23[%c1, %c0_11, %c0_12], %21 {strides = array<i32>} : memref<4x8x8xbf16, #tpu.memory_space<vmem>>, vector<1x8x8xbf16>,
    %22 = vector.extract_strided_slice %13 {offsets = [0, 16], sizes = [8, 8], strides = [1, 1]} : vector<8x32xbf16> to vector<8x8xbf16>
    %c2 = arith.constant 2 : index
    %c0_13 = arith.constant 0 : index
    %c0_14 = arith.constant 0 : index
    %23 = vector.load %arg23[%c2, %c0_13, %c0_14] : memref<4x8x8xbf16, #tpu.memory_space<vmem>>, vector<1x8x8xbf16>
    %24 = vector.shape_cast %23 : vector<1x8x8xbf16> to vector<8x8xbf16>
    %25 = vector.shape_cast %22 : vector<8x8xbf16> to vector<1x8x8xbf16>
    tpu.vector_store %arg23[%c2, %c0_13, %c0_14], %25 {strides = array<i32>} : memref<4x8x8xbf16, #tpu.memory_space<vmem>>, vector<1x8x8xbf16>,
    %26 = vector.extract_strided_slice %13 {offsets = [0, 24], sizes = [8, 8], strides = [1, 1]} : vector<8x32xbf16> to vector<8x8xbf16>
    %c3 = arith.constant 3 : index
    %c0_15 = arith.constant 0 : index
    %c0_16 = arith.constant 0 : index
    %27 = vector.load %arg23[%c3, %c0_15, %c0_16] : memref<4x8x8xbf16, #tpu.memory_space<vmem>>, vector<1x8x8xbf16>
    %28 = vector.shape_cast %27 : vector<1x8x8xbf16> to vector<8x8xbf16>
    %29 = vector.shape_cast %26 : vector<8x8xbf16> to vector<1x8x8xbf16>
    tpu.vector_store %arg23[%c3, %c0_15, %c0_16], %29 {strides = array<i32>} : memref<4x8x8xbf16, #tpu.memory_space<vmem>>, vector<1x8x8xbf16>,
    %c0_17 = arith.constant 0 : index
    %c0_18 = arith.constant 0 : index
    %c0_19 = arith.constant 0 : index
    %30 = vector.load %arg23[%c0_17, %c0_18, %c0_19] : memref<4x8x8xbf16, #tpu.memory_space<vmem>>, vector<4x8x8xbf16>
    %c0_20 = arith.constant 0 : index
    %c0_21 = arith.constant 0 : index
    %c0_22 = arith.constant 0 : index
    %31 = vector.load %arg21[%c0_20, %c0_21, %c0_22] : memref<4x8x8xbf16, #tpu.memory_space<vmem>>, vector<4x8x8xbf16>
    %c0_23 = arith.constant 0 : index
    %c0_24 = arith.constant 0 : index
    %c0_25 = arith.constant 0 : index
    %32 = vector.load %arg22[%c0_23, %c0_24, %c0_25] : memref<4x8x8xbf16, #tpu.memory_space<vmem>>, vector<4x8x8xbf16>
    "tpu.trace_start"() <{level = 10 : i32, message = "hqd,hkd->hqk"}> : () -> ()
    %cst_26 = arith.constant dense<0.000000e+00> : vector<4x8x8xf32>
    %33 = tpu.matmul %30, %31, %cst_26 {dimension_numbers = #tpu.dot_dimension_numbers<[2], [2], [1], [1], [0, 0, 0, 1, 1, 1], [0], [0]>} : vector<4x8x8xbf16>, vector<4x8x8xbf16>, vector<4x8x8xf32> -> vector<4x8x8xf32>
    "tpu.trace_stop"() : () -> ()
    %cst_27 = arith.constant dense<0xFF800000> : vector<4x8xf32>
    %34 = vector.multi_reduction <maximumf>, %33, %cst_27 [2] : vector<4x8x8xf32> to vector<4x8xf32>
    %35 = vector.shape_cast %34 : vector<4x8xf32> to vector<4x8x1xf32>
    %36 = vector.broadcast %35 : vector<4x8x1xf32> to vector<4x8x8xf32>
    %37 = arith.subf %33, %36 : vector<4x8x8xf32>
    %38 = math.exp %37 : vector<4x8x8xf32>
    %cst_28 = arith.constant dense<0.000000e+00> : vector<4x8xf32>
    %39 = vector.multi_reduction <add>, %38, %cst_28 [2] : vector<4x8x8xf32> to vector<4x8xf32>
    %40 = vector.shape_cast %39 : vector<4x8xf32> to vector<4x8x1xf32>
    %41 = tpu.reciprocal %40 {approx = true} : vector<4x8x1xf32> -> vector<4x8x1xf32>
    %42 = vector.broadcast %41 : vector<4x8x1xf32> to vector<4x8x8xf32>
    %43 = arith.mulf %38, %42 : vector<4x8x8xf32>
    %44 = arith.truncf %43 : vector<4x8x8xf32> to vector<4x8x8xbf16>
    "tpu.trace_start"() <{level = 10 : i32, message = "hqk,hkd->hqd"}> : () -> ()
    %cst_29 = arith.constant dense<0.000000e+00> : vector<4x8x8xf32>
    %45 = tpu.matmul %44, %32, %cst_29 {dimension_numbers = #tpu.dot_dimension_numbers<[2], [1], [1], [2], [0, 0, 0, 1, 1, 2], [0], [0]>} : vector<4x8x8xbf16>, vector<4x8x8xbf16>, vector<4x8x8xf32> -> vector<4x8x8xf32>
    "tpu.trace_stop"() : () -> ()
    %46 = arith.truncf %45 : vector<4x8x8xf32> to vector<4x8x8xbf16>
    %c0_30 = arith.constant 0 : index
    %c0_31 = arith.constant 0 : index
    %c0_32 = arith.constant 0 : index
    %47 = vector.load %arg10[%c0_30, %c0_31, %c0_32] : memref<4x8x32xbf16, #tpu.memory_space<vmem>>, vector<4x8x32xbf16>
    "tpu.trace_start"() <{level = 10 : i32, message = "hqd,hde->hqe"}> : () -> ()
    %cst_33 = arith.constant dense<0.000000e+00> : vector<4x8x32xf32>
    %48 = tpu.matmul %46, %47, %cst_33 {dimension_numbers = #tpu.dot_dimension_numbers<[2], [1], [1], [2], [0, 0, 0, 1, 1, 2], [0], [0]>} : vector<4x8x8xbf16>, vector<4x8x32xbf16>, vector<4x8x32xf32> -> vector<4x8x32xf32>
    "tpu.trace_stop"() : () -> ()
    %49 = vector.extract_strided_slice %48 {offsets = [0, 0, 0], sizes = [1, 8, 32], strides = [1, 1, 1]} : vector<4x8x32xf32> to vector<1x8x32xf32>
    %50 = vector.shape_cast %49 : vector<1x8x32xf32> to vector<8x32xf32>
    %51 = vector.extract_strided_slice %48 {offsets = [1, 0, 0], sizes = [1, 8, 32], strides = [1, 1, 1]} : vector<4x8x32xf32> to vector<1x8x32xf32>
    %52 = vector.shape_cast %51 : vector<1x8x32xf32> to vector<8x32xf32>
    %53 = arith.addf %50, %52 : vector<8x32xf32>
    %54 = vector.extract_strided_slice %48 {offsets = [2, 0, 0], sizes = [1, 8, 32], strides = [1, 1, 1]} : vector<4x8x32xf32> to vector<1x8x32xf32>
    %55 = vector.shape_cast %54 : vector<1x8x32xf32> to vector<8x32xf32>
    %56 = arith.addf %53, %55 : vector<8x32xf32>
    %57 = vector.extract_strided_slice %48 {offsets = [3, 0, 0], sizes = [1, 8, 32], strides = [1, 1, 1]} : vector<4x8x32xf32> to vector<1x8x32xf32>
    %58 = vector.shape_cast %57 : vector<1x8x32xf32> to vector<8x32xf32>
    %59 = arith.addf %56, %58 : vector<8x32xf32>
    %c0_34 = arith.constant 0 : index
    %c0_35 = arith.constant 0 : index
    %60 = vector.load %arg11[%c0_34, %c0_35] : memref<1x32xf32, #tpu.memory_space<vmem>>, vector<1x32xf32>
    %61 = vector.broadcast %60 : vector<1x32xf32> to vector<8x32xf32>
    %62 = arith.addf %59, %61 : vector<8x32xf32>
    %63 = arith.addf %4, %62 : vector<8x32xf32>
    %cst_36 = arith.constant dense<0.000000e+00> : vector<8xf32>
    %64 = vector.multi_reduction <add>, %63, %cst_36 [1] : vector<8x32xf32> to vector<8xf32>
    %65 = vector.shape_cast %64 : vector<8xf32> to vector<8x1xf32>
    %cst_37 = arith.constant 3.200000e+01 : f32
    %66 = vector.broadcast %cst_37 : f32 to vector<8x1xf32>
    %67 = arith.divf %65, %66 : vector<8x1xf32>
    %68 = vector.broadcast %67 : vector<8x1xf32> to vector<8x32xf32>
    %69 = arith.subf %63, %68 : vector<8x32xf32>
    %70 = vector.broadcast %67 : vector<8x1xf32> to vector<8x32xf32>
    %71 = arith.subf %63, %70 : vector<8x32xf32>
    %72 = arith.mulf %69, %71 : vector<8x32xf32>
    %cst_38 = arith.constant dense<0.000000e+00> : vector<8xf32>
    %73 = vector.multi_reduction <add>, %72, %cst_38 [1] : vector<8x32xf32> to vector<8xf32>
    %74 = vector.shape_cast %73 : vector<8xf32> to vector<8x1xf32>
    %cst_39 = arith.constant 3.200000e+01 : f32
    %75 = vector.broadcast %cst_39 : f32 to vector<8x1xf32>
    %76 = arith.divf %74, %75 : vector<8x1xf32>
    %77 = vector.broadcast %67 : vector<8x1xf32> to vector<8x32xf32>
    %78 = arith.subf %63, %77 : vector<8x32xf32>
    %cst_40 = arith.constant 9.99999974E-6 : f32
    %79 = vector.broadcast %cst_40 : f32 to vector<8x1xf32>
    %80 = arith.addf %76, %79 : vector<8x1xf32>
    %81 = math.rsqrt %80 : vector<8x1xf32>
    %82 = vector.broadcast %81 : vector<8x1xf32> to vector<8x32xf32>
    %83 = arith.mulf %78, %82 : vector<8x32xf32>
    %c0_41 = arith.constant 0 : index
    %c0_42 = arith.constant 0 : index
    %84 = vector.load %arg12[%c0_41, %c0_42] : memref<1x32xf32, #tpu.memory_space<vmem>>, vector<1x32xf32>
    %85 = vector.broadcast %84 : vector<1x32xf32> to vector<8x32xf32>
    %86 = arith.mulf %83, %85 : vector<8x32xf32>
    %c0_43 = arith.constant 0 : index
    %c0_44 = arith.constant 0 : index
    %87 = vector.load %arg13[%c0_43, %c0_44] : memref<1x32xf32, #tpu.memory_space<vmem>>, vector<1x32xf32>
    %88 = vector.broadcast %87 : vector<1x32xf32> to vector<8x32xf32>
    %89 = arith.addf %86, %88 : vector<8x32xf32>
    %90 = arith.truncf %89 : vector<8x32xf32> to vector<8x32xbf16>
    %c0_45 = arith.constant 0 : index
    %c0_46 = arith.constant 0 : index
    %91 = vector.load %arg14[%c0_45, %c0_46] : memref<32x128xbf16, #tpu.memory_space<vmem>>, vector<32x128xbf16>
    %cst_47 = arith.constant dense<0.000000e+00> : vector<8x128xf32>
    %92 = tpu.matmul %90, %91, %cst_47 {dimension_numbers = #tpu.dot_dimension_numbers<[1], [0], [0], [1], [0, 0, 1, 1], [], []>} : vector<8x32xbf16>, vector<32x128xbf16>, vector<8x128xf32> -> vector<8x128xf32>
    %c0_48 = arith.constant 0 : index
    %c0_49 = arith.constant 0 : index
    %93 = vector.load %arg15[%c0_48, %c0_49] : memref<1x128xf32, #tpu.memory_space<vmem>>, vector<1x128xf32>
    %94 = vector.broadcast %93 : vector<1x128xf32> to vector<8x128xf32>
    %95 = arith.addf %92, %94 : vector<8x128xf32>
    %cst_50 = arith.constant 0.000000e+00 : f32
    %96 = vector.broadcast %cst_50 : f32 to vector<8x128xf32>
    %97 = arith.maximumf %95, %96 : vector<8x128xf32>
    %98 = arith.truncf %97 : vector<8x128xf32> to vector<8x128xbf16>
    %c0_51 = arith.constant 0 : index
    %c0_52 = arith.constant 0 : index
    %99 = vector.load %arg16[%c0_51, %c0_52] : memref<128x32xbf16, #tpu.memory_space<vmem>>, vector<128x32xbf16>
    %cst_53 = arith.constant dense<0.000000e+00> : vector<8x32xf32>
    %100 = tpu.matmul %98, %99, %cst_53 {dimension_numbers = #tpu.dot_dimension_numbers<[1], [0], [0], [1], [0, 0, 1, 1], [], []>} : vector<8x128xbf16>, vector<128x32xbf16>, vector<8x32xf32> -> vector<8x32xf32>
    %c0_54 = arith.constant 0 : index
    %c0_55 = arith.constant 0 : index
    %101 = vector.load %arg17[%c0_54, %c0_55] : memref<1x32xf32, #tpu.memory_space<vmem>>, vector<1x32xf32>
    %102 = vector.broadcast %101 : vector<1x32xf32> to vector<8x32xf32>
    %103 = arith.addf %100, %102 : vector<8x32xf32>
    %104 = arith.addf %89, %103 : vector<8x32xf32>
    %cst_56 = arith.constant dense<0.000000e+00> : vector<8xf32>
    %105 = vector.multi_reduction <add>, %104, %cst_56 [1] : vector<8x32xf32> to vector<8xf32>
    %106 = vector.shape_cast %105 : vector<8xf32> to vector<8x1xf32>
    %cst_57 = arith.constant 3.200000e+01 : f32
    %107 = vector.broadcast %cst_57 : f32 to vector<8x1xf32>
    %108 = arith.divf %106, %107 : vector<8x1xf32>
    %109 = vector.broadcast %108 : vector<8x1xf32> to vector<8x32xf32>
    %110 = arith.subf %104, %109 : vector<8x32xf32>
    %111 = vector.broadcast %108 : vector<8x1xf32> to vector<8x32xf32>
    %112 = arith.subf %104, %111 : vector<8x32xf32>
    %113 = arith.mulf %110, %112 : vector<8x32xf32>
    %cst_58 = arith.constant dense<0.000000e+00> : vector<8xf32>
    %114 = vector.multi_reduction <add>, %113, %cst_58 [1] : vector<8x32xf32> to vector<8xf32>
    %115 = vector.shape_cast %114 : vector<8xf32> to vector<8x1xf32>
    %cst_59 = arith.constant 3.200000e+01 : f32
    %116 = vector.broadcast %cst_59 : f32 to vector<8x1xf32>
    %117 = arith.divf %115, %116 : vector<8x1xf32>
    %118 = vector.broadcast %108 : vector<8x1xf32> to vector<8x32xf32>
    %119 = arith.subf %104, %118 : vector<8x32xf32>
    %cst_60 = arith.constant 9.99999974E-6 : f32
    %120 = vector.broadcast %cst_60 : f32 to vector<8x1xf32>
    %121 = arith.addf %117, %120 : vector<8x1xf32>
    %122 = math.rsqrt %121 : vector<8x1xf32>
    %123 = vector.broadcast %122 : vector<8x1xf32> to vector<8x32xf32>
    %124 = arith.mulf %119, %123 : vector<8x32xf32>
    %c0_61 = arith.constant 0 : index
    %c0_62 = arith.constant 0 : index
    %125 = vector.load %arg18[%c0_61, %c0_62] : memref<1x32xf32, #tpu.memory_space<vmem>>, vector<1x32xf32>
    %126 = vector.broadcast %125 : vector<1x32xf32> to vector<8x32xf32>
    %127 = arith.mulf %124, %126 : vector<8x32xf32>
    %c0_63 = arith.constant 0 : index
    %c0_64 = arith.constant 0 : index
    %128 = vector.load %arg19[%c0_63, %c0_64] : memref<1x32xf32, #tpu.memory_space<vmem>>, vector<1x32xf32>
    %129 = vector.broadcast %128 : vector<1x32xf32> to vector<8x32xf32>
    %130 = arith.addf %127, %129 : vector<8x32xf32>
    %c0_65 = arith.constant 0 : index
    %c0_66 = arith.constant 0 : index
    %c0_67 = arith.constant 0 : index
    %131 = vector.load %arg20[%c0_65, %c0_66, %c0_67] : memref<1x8x32xf32, #tpu.memory_space<vmem>>, vector<1x8x32xf32>
    %132 = vector.shape_cast %131 : vector<1x8x32xf32> to vector<8x32xf32>
    %133 = vector.shape_cast %130 : vector<8x32xf32> to vector<1x8x32xf32>
    tpu.vector_store %arg20[%c0_65, %c0_66, %c0_67], %133 {strides = array<i32>} : memref<1x8x32xf32, #tpu.memory_space<vmem>>, vector<1x8x32xf32>,
    return
  }
  func.func @transform_0(%arg0: i32, %arg1: i32) -> (i32, i32, i32) {
    %c0_i32 = arith.constant 0 : i32
    %c0_i32_0 = arith.constant 0 : i32
    return %arg0, %arg1, %c0_i32 : i32, i32, i32
  }
  func.func @transform_1(%arg0: i32, %arg1: i32) -> (i32, i32, i32) {
    %c0_i32 = arith.constant 0 : i32
    %c0_i32_0 = arith.constant 0 : i32
    %c0_i32_1 = arith.constant 0 : i32
    return %arg0, %c0_i32, %c0_i32_0 : i32, i32, i32
  }
  func.func @transform_2(%arg0: i32, %arg1: i32) -> (i32, i32) {
    %c0_i32 = arith.constant 0 : i32
    %c0_i32_0 = arith.constant 0 : i32
    %c0_i32_1 = arith.constant 0 : i32
    return %c0_i32, %c0_i32_0 : i32, i32
  }
  func.func @transform_3(%arg0: i32, %arg1: i32) -> (i32, i32) {
    %c0_i32 = arith.constant 0 : i32
    %c0_i32_0 = arith.constant 0 : i32
    %c0_i32_1 = arith.constant 0 : i32
    return %c0_i32, %c0_i32_0 : i32, i32
  }
  func.func @transform_4(%arg0: i32, %arg1: i32) -> (i32, i32) {
    %c0_i32 = arith.constant 0 : i32
    %c0_i32_0 = arith.constant 0 : i32
    %c0_i32_1 = arith.constant 0 : i32
    return %c0_i32, %c0_i32_0 : i32, i32
  }
  func.func @transform_5(%arg0: i32, %arg1: i32) -> (i32, i32) {
    %c0_i32 = arith.constant 0 : i32
    %c0_i32_0 = arith.constant 0 : i32
    %c0_i32_1 = arith.constant 0 : i32
    return %c0_i32, %c0_i32_0 : i32, i32
  }
  func.func @transform_6(%arg0: i32, %arg1: i32) -> (i32, i32) {
    %c0_i32 = arith.constant 0 : i32
    %c0_i32_0 = arith.constant 0 : i32
    %c0_i32_1 = arith.constant 0 : i32
    return %c0_i32, %c0_i32_0 : i32, i32
  }
  func.func @transform_7(%arg0: i32, %arg1: i32) -> (i32, i32) {
    %c0_i32 = arith.constant 0 : i32
    %c0_i32_0 = arith.constant 0 : i32
    %c0_i32_1 = arith.constant 0 : i32
    return %c0_i32, %c0_i32_0 : i32, i32
  }
  func.func @transform_8(%arg0: i32, %arg1: i32) -> (i32, i32, i32) {
    %c0_i32 = arith.constant 0 : i32
    %c0_i32_0 = arith.constant 0 : i32
    %c0_i32_1 = arith.constant 0 : i32
    %c0_i32_2 = arith.constant 0 : i32
    return %c0_i32, %c0_i32_0, %c0_i32_1 : i32, i32, i32
  }
  func.func @transform_9(%arg0: i32, %arg1: i32) -> (i32, i32) {
    %c0_i32 = arith.constant 0 : i32
    %c0_i32_0 = arith.constant 0 : i32
    %c0_i32_1 = arith.constant 0 : i32
    return %c0_i32, %c0_i32_0 : i32, i32
  }
  func.func @transform_10(%arg0: i32, %arg1: i32) -> (i32, i32) {
    %c0_i32 = arith.constant 0 : i32
    %c0_i32_0 = arith.constant 0 : i32
    %c0_i32_1 = arith.constant 0 : i32
    return %c0_i32, %c0_i32_0 : i32, i32
  }
  func.func @transform_11(%arg0: i32, %arg1: i32) -> (i32, i32) {
    %c0_i32 = arith.constant 0 : i32
    %c0_i32_0 = arith.constant 0 : i32
    %c0_i32_1 = arith.constant 0 : i32
    return %c0_i32, %c0_i32_0 : i32, i32
  }
  func.func @transform_12(%arg0: i32, %arg1: i32) -> (i32, i32) {
    %c0_i32 = arith.constant 0 : i32
    %c0_i32_0 = arith.constant 0 : i32
    %c0_i32_1 = arith.constant 0 : i32
    return %c0_i32, %c0_i32_0 : i32, i32
  }
  func.func @transform_13(%arg0: i32, %arg1: i32) -> (i32, i32) {
    %c0_i32 = arith.constant 0 : i32
    %c0_i32_0 = arith.constant 0 : i32
    %c0_i32_1 = arith.constant 0 : i32
    return %c0_i32, %c0_i32_0 : i32, i32
  }
  func.func @transform_14(%arg0: i32, %arg1: i32) -> (i32, i32) {
    %c0_i32 = arith.constant 0 : i32
    %c0_i32_0 = arith.constant 0 : i32
    %c0_i32_1 = arith.constant 0 : i32
    return %c0_i32, %c0_i32_0 : i32, i32
  }
  func.func @transform_15(%arg0: i32, %arg1: i32) -> (i32, i32) {
    %c0_i32 = arith.constant 0 : i32
    %c0_i32_0 = arith.constant 0 : i32
    %c0_i32_1 = arith.constant 0 : i32
    return %c0_i32, %c0_i32_0 : i32, i32
  }
  func.func @transform_16(%arg0: i32, %arg1: i32) -> (i32, i32) {
    %c0_i32 = arith.constant 0 : i32
    %c0_i32_0 = arith.constant 0 : i32
    %c0_i32_1 = arith.constant 0 : i32
    return %c0_i32, %c0_i32_0 : i32, i32
  }
  func.func @transform_17(%arg0: i32, %arg1: i32) -> (i32, i32) {
    %c0_i32 = arith.constant 0 : i32
    %c0_i32_0 = arith.constant 0 : i32
    %c0_i32_1 = arith.constant 0 : i32
    return %c0_i32, %c0_i32_0 : i32, i32
  }
  func.func @transform_18(%arg0: i32, %arg1: i32) -> (i32, i32, i32) {
    %c0_i32 = arith.constant 0 : i32
    %c0_i32_0 = arith.constant 0 : i32
    return %arg0, %arg1, %c0_i32 : i32, i32, i32
  }
}

</mosaic_0001>

<bundles_post_ra>
// kernel: tpu_custom_call.1
= control target key start
LH: loop header
LB: loop body
LE: loop exit
PB: predicated region body
PF: predicated region fallthrough
CT: control target
= control target key end

     0   :  { %s3107_s0 = inlined_call_operand.vmem [shape: f32[2,8,32], index: 0, kind: input, shape index: {}]   ;;  %s3108_s1 = inlined_call_operand.hbm [shape: bf16[2,8,32], index: 1, kind: input, shape index: {}]   ;;  %s3109_s2 = inlined_call_operand.vmem [shape: bf16[32,32], index: 2, kind: input, shape index: {}]   ;;  %s3110_s3 = inlined_call_operand.hbm [shape: f32[1,32], index: 3, kind: input, shape index: {}]   ;;  %s3111_s4 = inlined_call_operand.vmem [shape: bf16[32,32], index: 4, kind: input, shape index: {}]   ;;  %s3112_s5 = inlined_call_operand.hbm [shape: f32[1,32], index: 5, kind: input, shape index: {}]   ;;  %s3113_s6 = inlined_call_operand.vmem [shape: bf16[32,32], index: 6, kind: input, shape index: {}]   ;;  %s3114_s7 = inlined_call_operand.hbm [shape: f32[1,32], index: 7, kind: input, shape index: {}]   ;;  %s3115_s8 = inlined_call_operand.vmem [shape: bf16[4,8,32], index: 8, kind: input, shape index: {}]   ;;  %s3116_s9 = inlined_call_operand.hbm [shape: f32[1,32], index: 9, kind: input, shape index: {}]   ;;  %s3117_s10 = inlined_call_operand.vmem [shape: f32[1,32], index: 10, kind: input, shape index: {}]   ;;  %s3118_s11 = inlined_call_operand.vmem [shape: f32[1,32], index: 11, kind: input, shape index: {}]   ;;  %s3119_s12 = inlined_call_operand.vmem [shape: bf16[32,128], index: 12, kind: input, shape index: {}]   ;;  %s3120_s13 = inlined_call_operand.vmem [shape: f32[1,128], index: 13, kind: input, shape index: {}]   ;;  %s3121_s14 = inlined_call_operand.vmem [shape: bf16[128,32], index: 14, kind: input, shape index: {}]   ;;  %s3122_s15 = inlined_call_operand.vmem [shape: f32[1,32], index: 15, kind: input, shape index: {}]   ;;  %s3123_s16 = inlined_call_operand.vmem [shape: f32[1,32], index: 16, kind: input, shape index: {}]   ;;  %s3124_s17 = inlined_call_operand.vmem [shape: f32[1,32], index: 17, kind: input, shape index: {}]   ;;  %s3125_s18 = inlined_call_operand.hbm [shape: f32[2,8,32], index: 18, kind: output, shape index: {}]  }
   0x1   :  { %3135 = sst [smem:[#allocation24_spill]] %s3107_s0 }
   0x2   :  { %3136 = sst [smem:[#allocation25_spill]] %s3108_s1 }
   0x3   :  { %3137 = sst [smem:[#allocation26_spill]] %s3109_s2 }
   0x4   :  { %3138 = sst [smem:[#allocation27_spill]] %s3110_s3 }
   0x5   :  { %3139 = sst [smem:[#allocation28_spill]] %s3112_s5 }
   0x6   :  { %3140 = sst [smem:[#allocation29_spill]] %s3114_s7 }
   0x7   :  { %3141 = sst [smem:[#allocation30_spill]] %s3116_s9 }
   0x8   :  { %3142 = sst [smem:[#allocation31_spill]] %s3122_s15 }
   0x9   :  { %3143 = sst [smem:[#allocation32_spill]] %s3123_s16 }
   0xa   :  { %3144 = sst [smem:[#allocation33_spill]] %s3124_s17 }
   0xb   :  { %3145 = sst [smem:[#allocation34_spill]] %s3125_s18 }
   0xc   :  { %23 = vsyncpa [#allocation6], 0 }
   0xd   :  { %25 = vsyncpa [#allocation6 + $0x1], 0 }
   0xe   :  { %26 = vsyncpa [#allocation9], 0 }
   0xf   :  { %27 = vsyncpa [#allocation12], 0 }
  0x10   :  { %28 = vsyncpa [#allocation7], 0 }
  0x11   :  { %30 = vsyncpa [#allocation7 + $0x1], 0  ;;  %s2684_s27 = smov 0   ;;  %s2686_s28 = smov 0  }
  0x12   :  { %s2688_s29 = smov 0   ;;  %s2690_s30 = smov 0  }
  0x13   :  { %s2692_s0 = smov 0   ;;  %s2694_s19 = smov 0  }
  0x14 LB: > { %3146 = sst [smem:[#allocation19_spill]] %s2556_s27  ;;  %s3127_s1 = sadd.s32 4294967295, %s2576_s19   ;;  %s2576_s19 = sphi %s2694_s19, %s36_s19   ;;  %s2572_s0 = sphi %s2692_s0, %s3177_s0   ;;  %s2568_s30 = sphi %s2690_s30, %s3176_s30   ;;  %s2564_s29 = sphi %s2688_s29, %s3180_s29   ;;  %s2560_s28 = sphi %s2686_s28, %s3179_s28   ;;  %s2556_s27 = sphi %s2684_s27, %s3178_s27  }
  0x15   : > { %3147 = sst [smem:[#allocation20_spill]] %s2572_s0  ;;  %p1975_p0 = scmp.ge.s32.totalorder %s2576_s19, 1 }
  0x16   : > { %p2718_p1 = scmp.eq.s32.totalorder %s3127_s1, 0  ;;  %p471_p2 = scmp.lt.s32.totalorder %s2576_s19, 3 }
  0x17   : > { %s2578_s22 = smov [#allocation8]   ;;  %s2579_s23 = smov [#allocation11]  }
  0x18   : > { %p2723_p3 = pnand %p1975_p0, %p471_p2  ;;  %s487_s2 = sshll.u32 %s2578_s22, 4  ;;  %s488_s2 = int_to_ptr.vmem [resolvable:$true] %s487_s2 }
  0x19   : > { %s515_s24 = sshll.u32 %s2579_s23, 4  ;;  %s2580_s26 = smov [#allocation10]   ;;  %s516_s24 = int_to_ptr.vmem [resolvable:$true] %s515_s24 }
  0x1a   : > { %s3149_s21 = scalar_select %p2723_p3, 1, 0 }
  0x1b   : > { %p2232_p5 = pneg %p2723_p3  ;;  %s501_s1 = sshll.u32 %s2580_s26, 4  ;;  %s2736_s1 = int_to_ptr.vmem [resolvable:$true] %s501_s1 }
  0x1c   : > { %s2367_s22 = scalar_lea.vmem %s488_s2, 16  ;;  %s2374_s23 = scalar_lea.vmem %s488_s2, 32 }
  0x1d   : > { %p2732_p6 = pnand %p2232_p5, %p2718_p1  ;;  %p2368_p8 = scmp.ne.s32.totalorder %s488_s2, %s2367_s22 }
  0x1e   : > { %p2375_p11 = scmp.lt.s32.totalorder %s488_s2, %s488_s2  ;;  %p2376_p12 = scmp.lt.s32.totalorder %s2374_s23, %s2367_s22 }
  0x1f   : > { %p2358_p7 = pneg %p2732_p6 }
  0x20   : > { %p2377_p13 = por %p2376_p12, %p2375_p11 }
  0x21   : > { %p2370_p9 = pnand %p2368_p8, %p2358_p7 }
  0x23   : > { %p2371_p10 = pneg %p2370_p9 }
  0x25   : > { %p2378_p0 = pnand %p2377_p13, %p2371_p10 }
  0x27   : > { %2381 = shalt.err (!%p2378_p0)
}
  0x28   : > { %s3151_s3 = sld [smem:[#allocation27_spill]]  ;;  %s2393_s17 = scalar_lea.vmem %s516_s24, 16 }
  0x29   : > { %p2394_p2 = scmp.ne.s32.totalorder %s516_s24, %s2393_s17  ;;  %s2400_s16 = scalar_lea.vmem %s516_s24, 32 }
  0x2a   : > { %p2401_p9 = scmp.lt.s32.totalorder %s516_s24, %s516_s24  ;;  %p2402_p4 = scmp.lt.s32.totalorder %s2400_s16, %s2393_s17 }
  0x2b   : > { %p2396_p5 = pnand %p2394_p2, %p2358_p7 }
  0x2c   : > { %p2403_p3 = por %p2402_p4, %p2401_p9 }
  0x2d   : > { %p2397_p8 = pneg %p2396_p5 }
  0x2e   : > { %2235 = dma.hbm_to_vmem [thread:$0]  (!%p2732_p6), %s3151_s3, 16, %s488_s2, [#allocation9]  }
  0x2f   : > { %p2404_p11 = pnand %p2403_p3, %p2397_p8 }
  0x31   : > { %2407 = shalt.err (!%p2404_p11)
}
  0x32   : > { %s3152_s7 = sld [smem:[#allocation29_spill]]  ;;  %s2419_s18 = scalar_lea.vmem %s2736_s1, 16 }
  0x33   : > { %p2420_p10 = scmp.ne.s32.totalorder %s2736_s1, %s2419_s18  ;;  %s2426_s16 = scalar_lea.vmem %s2736_s1, 32 }
  0x34   : > { %p2427_p3 = scmp.lt.s32.totalorder %s2736_s1, %s2736_s1  ;;  %p2428_p4 = scmp.lt.s32.totalorder %s2426_s16, %s2419_s18 }
  0x35   : > { %p2422_p12 = pnand %p2420_p10, %p2358_p7 }
  0x36   : > { %p2429_p0 = por %p2428_p4, %p2427_p3 }
  0x37   : > { %p2423_p13 = pneg %p2422_p12 }
  0x38   : > { %2241 = dma.hbm_to_vmem [thread:$0]  (!%p2732_p6), %s3152_s7, 16, %s516_s24, [#allocation12]  }
  0x39   : > { %p2430_p2 = pnand %p2429_p0, %p2423_p13 }
  0x3b   : > { %2433 = shalt.err (!%p2430_p2)
}
  0x3c   : > { %s3153_s5 = sld [smem:[#allocation28_spill]]  ;;  %s2581_s24 = smov [#allocation13]  }
  0x3d   : > { %s529_s26 = sshll.u32 %s2581_s24, 4  ;;  %s530_s26 = int_to_ptr.vmem [resolvable:$true] %s529_s26 }
  0x3e   : > { %s2445_s22 = scalar_lea.vmem %s530_s26, 16  ;;  %s2452_s23 = scalar_lea.vmem %s530_s26, 32 }
  0x3f   : > { %p2446_p5 = scmp.ne.s32.totalorder %s530_s26, %s2445_s22  ;;  %p2453_p11 = scmp.lt.s32.totalorder %s530_s26, %s530_s26 }
  0x40   : > { %p2454_p10 = scmp.lt.s32.totalorder %s2452_s23, %s2445_s22 }
  0x41   : > { %p2448_p8 = pnand %p2446_p5, %p2358_p7 }
  0x42   : > { %2238 = dma.hbm_to_vmem [thread:$0]  (!%p2732_p6), %s3153_s5, 16, %s2736_s1, [#allocation9]  }
  0x43   : > { %p2449_p9 = pneg %p2448_p8  ;;  %p2455_p12 = por %p2454_p10, %p2453_p11 }
  0x45   : > { %p2456_p13 = pnand %p2455_p12, %p2449_p9 }
  0x47   : > { %2459 = shalt.err (!%p2456_p13)
}
  0x48   : > { %s3154_s9 = sld [smem:[#allocation30_spill]]  ;;  %s1974_s1 = sadd.s32 4294967294, %s2576_s19  }
  0x49   : > { %s48_s17 = sadd.s32 1, %s2572_s0  ;;  %s83_s25 = sadd.s32 1, %s2564_s29 }
  0x4a   : > { %p50_p7 = scmp.ge.s32.totalorder %s48_s17, 2  ;;  %p90_p3 = scmp.ne.s32.totalorder %s2564_s29, %s2560_s28 }
  0x4b   : > { %p91_p4 = scmp.eq.s32.totalorder %s2576_s19, 0  ;;  %p96_p2 = scmp.ne.s32.totalorder %s2560_s28, %s2556_s27 }
  0x4c   : > { %s3182_s17 = smov (%p50_p7, %s48_s17), 0  ;;  %p464_p11 = scmp.eq.s32.totalorder %s1974_s1, 1 }
  0x4d   : > { %3155 = sst [smem:[#allocation21_spill]] %s3182_s17  ;;  %p2786_p0 = por %p91_p4, %p90_p3 }
  0x4e   : > { %2244 = dma.hbm_to_vmem [thread:$0]  (!%p2732_p6), %s3154_s9, 16, %s530_s26, [#allocation12]  }
  0x4f   : > { %s80_s24 = ssub.s32 %s2572_s0, %s3182_s17  ;;  %s3157_s26 = sadd.s32 4294967295, %s2576_s19  }
  0x50   : > { %p458_p6 = scmp.eq.s32.totalorder %s3157_s26, 1  ;;  %p81_p5 = scmp.eq.s32.totalorder %s80_s24, 0 }
  0x51   : > { %p2798_p8 = por %p2718_p1, %p96_p2  ;;  %p2809_p10 = por %p464_p11, %p96_p2 }
  0x52   : > { %p2802_p9 = por %p458_p6, %p90_p3  ;;  %p2257_p12 = scmp.lt.s32.totalorder %s2576_s19, 2 }
  0x53   : > { %s2807_s18 = scalar_select %p81_p5, %s2564_s29, %s83_s25  }
  0x54   : > { %s3159_s23 = scalar_select %p2802_p9, 1, 0 }
  0x55   : > { %3161 = sst [smem:[#allocation23_spill]] %s2807_s18  ;;  %s574_s3 = sand.u32 1, %s2564_s29  }
  0x56   : > { %3160 = sst [smem:[#allocation22_spill]] %s3159_s23  ;;  %s1982_s26 = sshll.u32 %s2572_s0, 6 }
  0x57   : > { %s1981_s24 = sshll.u32 %s574_s3, 2  ;;  %s3163_s9 = sld [smem:[#allocation25_spill]] }
  0x58   : > { %s578_s27 = scalar_lea.vmem [#allocation5], %s1981_s24  ;;  %p2821_p13 = pnand %p2257_p12, %p2786_p0 }
  0x59   : > { %s585_s15 = sshll.u32 %s578_s27, 4  ;;  %s575_s1 = scalar_lea.sflag [#allocation6], %s574_s3  ;;  %s586_s15 = int_to_ptr.vmem [resolvable:$true] %s585_s15 }
  0x5a   : > { %p2462_p7 = pneg %p2821_p13  ;;  %s2473_s25 = scalar_lea.vmem %s586_s15, 64 }
  0x5b   : > { %p2474_p3 = scmp.ne.s32.totalorder %s586_s15, %s2473_s25  ;;  %s2582_s0 = smov [#allocation5]  }
  0x5c   : > { %s2478_s18 = sshll.u32 %s2582_s0, 4  ;;  %s2479_s18 = int_to_ptr.vmem [resolvable:$false] %s2478_s18 }
  0x5d   : > { %s583_s17 = scalar_lea.hbm %s3163_s9, %s1982_s26  ;;  %p2476_p4 = pnand %p2474_p3, %p2462_p7 }
  0x5e   : > { %s2480_s5 = scalar_lea.vmem %s2479_s18, 128  ;;  %p2481_p6 = scmp.lt.s32.totalorder %s586_s15, %s2479_s18 }
  0x5f   : > { %p2477_p2 = pneg %p2476_p4  ;;  %p2482_p5 = scmp.lt.s32.totalorder %s2480_s5, %s2473_s25 }
  0x61   : > { %p2483_p11 = por %p2482_p5, %p2481_p6 }
  0x63   : > { %p2484_p0 = pnand %p2483_p11, %p2477_p2 }
  0x65   : > { %2487 = shalt.err (!%p2484_p0)
}
  0x66   : > { %2248 = dma.hbm_to_vmem [thread:$0]  (!%p2821_p13), %s583_s17, 64, %s586_s15, %s575_s1  }
  0x67   : > { %p3165_p12 = scmp.ne.s32.totalorder %s3149_s21, 0 }
  0x68   : > { %s2832_s3 = sand.u32 (!%p3165_p12), 1, %s2560_s28  }
  0x69   : > { %594 = sbr.rel (%p3165_p12) target bundleno = 2399 (0x95f), region = 92  ;;  %s1984_s7 = sshll.u32 (!%p3165_p12), %s2832_s3, 2 }
  0x6a   : > { %s597_s9 = scalar_lea.sflag (!%p3165_p12), [#allocation6], %s2832_s3  ;;  %s600_s27 = scalar_lea.vmem (!%p3165_p12), [#allocation5], %s1984_s7 }
  0x6e   : > { %2539 = dma.done.wait (%p2798_p8), %s597_s9, 64  }
  0x6f   : > { %2541 = vsyncadd (%p2798_p8), %s597_s9, 4294967232 }
  0x70   : > { %2543 = dma.done.wait (%p2718_p1), [#allocation9], 32  }
  0x71   : > { %2545 = vsyncadd (%p2718_p1), [#allocation9], 4294967264 }
  0x72   : > { %2547 = dma.done.wait (%p2718_p1), [#allocation12], 32  }
  0x73   : > { %2549 = vsyncadd (%p2718_p1), [#allocation12], 4294967264  ;;  %v2583_v0 = vmov 0.0   ;;  %vm2584_vm0 = vmmov 0   ;;  %p676_p8 = scmp.lt.s32.totalorder %s2568_s30, 1  ;;  %v2320_v1 = vld [vmem:[%s3111_s4 + $0x8] sm:$0xff]  }
  0x74   : > { %2088 = vmatprep.subr.bf16.mxu1 %v2583_v0  ;;  %2092 = vmatprep.mubr.msk.bf16.mxu1 %vm2584_vm0, %v2583_v0  ;;  %v2321_v2 = vld [vmem:[%s3111_s4] sm:$0xff]   ;;  %v688_v3 = vld [vmem:[%s600_s27] sm:$0xf]  ;;  %vm712_vm1 = vcmask 261120   ;;  %v2322_v4 = vld [vmem:[%s3113_s6 + $0x8] sm:$0xff]   ;;  %s3166_s25 = sld [smem:[#allocation26_spill]] }
  0x75   : > { %2118 = vmatprep.subr.bf16.mxu0 %v2583_v0  ;;  %2120 = vmatprep.mubr.msk.bf16.mxu0 %vm2584_vm0, %v2583_v0  ;;  %s677_s17 = scalar_select %p676_p8, %s2568_s30, 1  ;;  %v2323_v5 = vld [vmem:[%s3113_s6] sm:$0xff]   ;;  %v1991_v10 = vld [vmem:[#allocation10] ss:$0 sm:$0xff]  ;;  %vm821_vm2 = vcmask 60416   ;;  %vm963_vm3 = vcmask 64512  }
  0x76   : > { %2089 = vmatpush3.bf16.msra.mxu1 %v2320_v1  ;;  %s3167_s9 = sld [smem:[#allocation24_spill]]  ;;  %s2585_s20 = smov 104   ;;  %v1995_v17 = vld [vmem:[#allocation11] ss:$0 sm:$0xff]  ;;  %v2001_v26 = vld [vmem:[#allocation8] ss:$0 sm:$0xff] }
  0x77   : > { %2090 = vmatprep.subr.bf16.mxu1 %v2583_v0  ;;  %s1990_s23 = sshll.u32 %s677_s17, 3  ;;  %s2586_s21 = smov 120   ;;  %vm1199_vm4 = vcmask 1043456  }
  0x78   : > { %s2587_s17 = smov 112   ;;  %s3168_s26 = sld [smem:[#allocation31_spill]] }
  0x79   : > { %s1989_s24 = sshll.u32 %s2832_s3, 3  ;;  %s3171_s0 = sld [smem:[#allocation33_spill]] }
  0x7a   : > { %2091 = vmatpush3.bf16.msra.mxu1 %v2321_v2  ;;  %v2324_v6 = vld [vmem:[%s3166_s25 + $0x8] sm:$0xff]   ;;  %v2325_v7 = vld [vmem:[%s3166_s25] sm:$0xff]   ;;  %s2588_s7 = smov [#allocation14]  }
  0x7b   : > { %2096 = vmatprep.subr.bf16.mxu1 %v2583_v0 }
  0x7c   : > { %s682_s27 = scalar_lea.vmem %s3167_s9, %s1990_s23  ;;  %s3170_s9 = sld [smem:[#allocation32_spill]] }
  0x7d   : > { %2093 = vmatmul.mubr.msk.bf16.vlgmr.msra.gmra.mxu1 %vm712_vm1, %v688_v3  ;;  %v2887_v8 = vld [vmem:[%s682_s27] sm:$0xff]  ;;  %s3172_s23 = sld [smem:[#allocation34_spill]] }
  0x7e   : > { %2097 = vmatpush3.bf16.msra.mxu1 %v2322_v4  ;;  %2100 = vmatprep.mubr.msk.bf16.mxu1 %vm2584_vm0, %v2583_v0  ;;  %v861_v9 = vpack.c.bf16 %v2887_v8, %v2887_v8 }
  0x7f   : > { %2098 = vmatprep.subr.bf16.mxu1 %v2583_v0 }
  0x82   : > { %2099 = vmatpush3.bf16.msra.mxu1 %v2323_v5 }
  0x83   : > { %2104 = vmatprep.subr.bf16.mxu1 %v2583_v0 }
  0x85   : > { %2101 = vmatmul.mubr.msk.bf16.vlgmr.msra.gmra.mxu1 %vm712_vm1, %v688_v3 }
  0x86   : > { %2105 = vmatpush3.bf16.msra.mxu1 %v2324_v6  ;;  %2108 = vmatprep.mubr.msk.bf16.mxu1 %vm2584_vm0, %v2583_v0 }
  0x87   : > { %2106 = vmatprep.subr.bf16.mxu1 %v2583_v0 }
  0x8a   : > { %2107 = vmatpush3.bf16.msra.mxu1 %v2325_v7 }
  0x8b   : > { %2112 = vmatprep.subr.bf16.mxu1 %v2583_v0 }
  0x8d   : > { %2109 = vmatmul.mubr.msk.bf16.vlgmr.msra.gmra.mxu1 %vm712_vm1, %v861_v9 }
  0x8e   : > { %2114 = vmatprep.mubr.msk.bf16.mxu1 %vm2584_vm0, %v2583_v0 }
 0x13d   : > { %v750_v11 = vpop.f32.mrf.mxu1 }
 0x13e   : > { %v751_v12 = vadd.f32 %v1991_v10, %v750_v11 }
 0x13f   : > { %v2094_v13 = vpop.f32.mrf.mxu1 }
 0x140   : > { %v756_v14 = vpack.c.bf16 %v751_v12, %v751_v12 }
 0x141   : > { %v753_v15 = vpop.f32.mrf.mxu1 }
 0x142   : > { %822 = vst.msk [vmem:[#allocation2] sm:$0xf] %vm821_vm2, %v756_v14  ;;  %850 = vrot.lane.b32.xlu1 %v756_v14, %s2585_s20  ;;  %827 = vrot.lane.b32.xlu0 %v756_v14, %s2586_s21 }
 0x143   : > { %v2095_v16 = vpop.f32.mrf.mxu1 }
 0x145   : > { %v814_v18 = vpop.f32.mrf.mxu1 }
 0x146   : > { %v815_v19 = vadd.f32 %v1995_v17, %v814_v18  ;;  %840 = vrot.lane.b32.xlu0 %v756_v14, %s2587_s17 }
 0x147   : > { %v2102_v20 = vpop.f32.mrf.mxu1 }
 0x148   : > { %v2900_v21 = vpack.c.bf16 %v815_v19, %v815_v19 }
 0x149   : > { %v817_v22 = vpop.f32.mrf.mxu1  ;;  %v955_v23 = vld [vmem:[#allocation2] sm:$0xf] }
 0x14a   : > { %823 = vst.msk [vmem:[#allocation3] sm:$0xf] %vm821_vm2, %v2900_v21  ;;  %v968_v24 = vsel %vm963_vm3, %v955_v23, 0 }
 0x14b   : > { %v2103_v25 = vpop.f32.mrf.mxu1  ;;  %2113 = vmatpush3.bf16.xpose.msra.mxu1 %v968_v24 }
 0x14c   : > { %2124 = vmatprep.subr.bf16.mxu1 %v2583_v0 }
 0x14d   : > { %v923_v27 = vpop.f32.mrf.mxu1 }
 0x14e   : > { %v924_v28 = vadd.f32 %v2001_v26, %v923_v27 }
 0x14f   : > { %v2110_v29 = vpop.f32.mrf.mxu1 }
 0x150   : > { %v929_v30 = vmul.f32 0.35355338, %v924_v28 }
 0x151   : > { %v926_v31 = vpop.f32.mrf.mxu1  ;;  %v959_v46 = vld [vmem:[#allocation3] sm:$0xf] }
 0x152   : > { %v930_v32 = vpack.c.bf16 %v929_v30, %v929_v30  ;;  %v1201_v50 = vsel %vm1199_vm4, %v959_v46, 0 }
 0x153   : > { %v2111_v33 = vpop.f32.mrf.mxu1 }
 0x154   : > { %932 = vst.msk [vmem:[#allocation4] sm:$0xf] %vm821_vm2, %v930_v32  ;;  %941 = vrot.lane.b32.xlu0 %v930_v32, %s2587_s17  ;;  %936 = vrot.lane.b32.xlu1 %v930_v32, %s2586_s21 }
 0x158   : > { %946 = vrot.lane.b32.xlu1 %v930_v32, %s2585_s20 }
 0x15b   : > { %v951_v34 = vld [vmem:[#allocation4] sm:$0xf] }
 0x15c   : > { %2115 = vmatmul.mubr.msk.bf16.vlgmr.msra.gmra.mxu1 %vm963_vm3, %v951_v34 }
 0x15d   : > { %2126 = vmatprep.mubr.msk.bf16.mxu1 %vm2584_vm0, %v2583_v0 }
 0x1b4   : > { %v851_v35 = vpop.permute.xlu1 %850  ;;  %v828_v36 = vpop.permute.xlu0 %827 }
 0x1b5   : > { %854 = vst.msk [vmem:[#allocation2 + $0xc] sm:$0xf] %vm821_vm2, %v851_v35  ;;  %831 = vst.msk [vmem:[#allocation2 + $0x4] sm:$0xf] %vm821_vm2, %v828_v36 }
 0x1b8   : > { %v841_v37 = vpop.permute.xlu0 %840 }
 0x1b9   : > { %844 = vst.msk [vmem:[#allocation2 + $0x8] sm:$0xf] %vm821_vm2, %v841_v37 }
 0x1bc   : > { %v956_v38 = vld [vmem:[#allocation2 + $0x4] sm:$0xf]  ;;  %v958_v45 = vld [vmem:[#allocation2 + $0xc] sm:$0xf] }
 0x1bd   : > { %v1014_v39 = vsel %vm963_vm3, %v956_v38, 0  ;;  %v1106_v49 = vsel %vm963_vm3, %v958_v45, 0 }
 0x1be   : > { %2119 = vmatpush3.bf16.xpose.msra.mxu0 %v1014_v39 }
 0x1bf   : > { %2130 = vmatprep.subr.bf16.mxu0 %v2583_v0 }
 0x1c0   : > { %v957_v40 = vld [vmem:[#allocation2 + $0x8] sm:$0xf] }
 0x1c1   : > { %v1060_v41 = vsel %vm963_vm3, %v957_v40, 0 }
 0x1c2   : > { %2125 = vmatpush3.bf16.xpose.msra.mxu1 %v1060_v41 }
 0x1c3   : > { %2136 = vmatprep.subr.bf16.mxu1 %v2583_v0 }
 0x1c6   : > { %v942_v42 = vpop.permute.xlu0 %941  ;;  %v937_v43 = vpop.permute.xlu1 %936 }
 0x1c7   : > { %945 = vst.msk [vmem:[#allocation4 + $0x8] sm:$0xf] %vm821_vm2, %v942_v42  ;;  %940 = vst.msk [vmem:[#allocation4 + $0x4] sm:$0xf] %vm821_vm2, %v937_v43 }
 0x1ca   : > { %v947_v44 = vpop.permute.xlu1 %946 }
 0x1cb   : > { %950 = vst.msk [vmem:[#allocation4 + $0xc] sm:$0xf] %vm821_vm2, %v947_v44 }
 0x1ce   : > { %v952_v47 = vld [vmem:[#allocation4 + $0x4] sm:$0xf]  ;;  %v953_v48 = vld [vmem:[#allocation4 + $0x8] sm:$0xf] }
 0x1cf   : > { %2121 = vmatmul.mubr.msk.bf16.vlgmr.msra.gmra.mxu0 %vm963_vm3, %v952_v47  ;;  %2127 = vmatmul.mubr.msk.bf16.vlgmr.msra.gmra.mxu1 %vm963_vm3, %v953_v48 }
 0x1d0   : > { %2131 = vmatpush3.bf16.xpose.msra.mxu0 %v1106_v49  ;;  %2137 = vmatpush3.bf16.msra.mxu1 %v1201_v50  ;;  %v1385_v50 = vld [vmem:[%s3115_s8] sm:$0xf] }
 0x1d1   : > { %2132 = vmatprep.mubr.msk.bf16.mxu0 %vm2584_vm0, %v2583_v0  ;;  %2142 = vmatprep.subr.bf16.mxu0 %v2583_v0 }
 0x1d2   : > { %2138 = vmatprep.mubr.msk.bf16.mxu1 %vm2584_vm0, %v2583_v0  ;;  %2148 = vmatprep.subr.bf16.mxu1 %v2583_v0  ;;  %v954_v51 = vld [vmem:[#allocation4 + $0xc] sm:$0xf] }
 0x1d7   : > { %2133 = vmatmul.mubr.msk.bf16.vlgmr.msra.gmra.mxu0 %vm963_vm3, %v954_v51 }
 0x1d8   : > { %2144 = vmatprep.mubr.msk.bf16.mxu0 %vm2584_vm0, %v2583_v0 }
 0x21c   : > { %v1004_v52 = vpop.f32.mrf.mxu1 }
 0x21d   : > { %v1148_v53 = vsel %vm963_vm3, %v1004_v52, -inf }
 0x21e   : > { %1149 = vmax.xlane.f32.xlu0 %v1148_v53  ;;  %v2116_v54 = vpop.f32.mrf.mxu1 }
 0x220   : > { %v1007_v55 = vpop.f32.mrf.mxu1 }
 0x221   : > { %v1393_v55 = vsel %vm1199_vm4, %v1385_v50, 0  ;;  %v2328_v50 = vld [vmem:[%s3121_s14 + $0x38] sm:$0xff]  }
 0x222   : > { %v2117_v56 = vpop.f32.mrf.mxu1 }
 0x28f   : > { %v1050_v57 = vpop.f32.mrf.mxu0  ;;  %v1096_v58 = vpop.f32.mrf.mxu1 }
 0x290   : > { %v1151_v59 = vsel %vm963_vm3, %v1050_v57, -inf  ;;  %v1154_v60 = vsel %vm963_vm3, %v1096_v58, -inf }
 0x291   : > { %1152 = vmax.xlane.f32.xlu1 %v1151_v59  ;;  %v2122_v61 = vpop.f32.mrf.mxu0  ;;  %1155 = vmax.xlane.f32.xlu0 %v1154_v60  ;;  %v2128_v62 = vpop.f32.mrf.mxu1  ;;  %v1387_v59 = vld [vmem:[%s3115_s8 + $0x8] sm:$0xf] }
 0x292   : > { %v1485_v62 = vsel %vm1199_vm4, %v1387_v59, 0 }
 0x293   : > { %v1053_v63 = vpop.f32.mrf.mxu0  ;;  %v1099_v1 = vpop.f32.mrf.mxu1 }
 0x295   : > { %v2123_v2 = vpop.f32.mrf.mxu0  ;;  %v2129_v3 = vpop.f32.mrf.mxu1 }
 0x296   : > { %v1388_v3 = vld [vmem:[%s3115_s8 + $0xc] sm:$0xf] }
 0x297   : > { %v1142_v4 = vpop.f32.mrf.mxu0 }
 0x298   : > { %v1157_v5 = vsel %vm963_vm3, %v1142_v4, -inf }
 0x299   : > { %v2134_v6 = vpop.f32.mrf.mxu0  ;;  %1158 = vmax.xlane.f32.xlu0 %v1157_v5 }
 0x29a   : > { %v1531_v6 = vsel %vm1199_vm4, %v1388_v3, 0  ;;  %v2334_v3 = vld [vmem:[%s3121_s14 + $0x8] sm:$0xff]  }
 0x29b   : > { %v1145_v7 = vpop.f32.mrf.mxu0 }
 0x29d   : > { %v2135_v9 = vpop.f32.mrf.mxu0 }
 0x2a2   : > { %835 = vrot.lane.b32.xlu1 %v2900_v21, %s2586_s21  ;;  %s675_s21 = scalar_lea.vmem [#allocation14], %s1989_s24 }
 0x2a7   : > { %v1150_v10 = vpop.xlane.xlu0 %1149 }
 0x2a8   : > { %v1160_v11 = vsub.f32 %v1004_v52, %v1150_v10 }
 0x2aa   : > { %v1164_v12 = vmul.f32 1.442695, %v1160_v11 }
 0x2ac   : > { %2336 = vpow2.f32 %v1164_v12 }
 0x2b9   : > { %v2337_v13 = vpop.eup %2336 }
 0x2ba   : > { %v1172_v14 = vsel %vm963_vm3, %v2337_v13, 0.0 }
 0x2c6   : > { %1173 = vadd.xlane.f32.xlu1 %v1172_v14 }
 0x31a   : > { %v1153_v15 = vpop.xlane.xlu1 %1152  ;;  %v1156_v16 = vpop.xlane.xlu0 %1155 }
 0x31b   : > { %v1161_v17 = vsub.f32 %v1050_v57, %v1153_v15  ;;  %v1162_v18 = vsub.f32 %v1096_v58, %v1156_v16  ;;  %v1386_v57 = vld [vmem:[%s3115_s8 + $0x4] sm:$0xf] }
 0x31c   : > { %v1439_v58 = vsel %vm1199_vm4, %v1386_v57, 0 }
 0x31d   : > { %v1166_v19 = vmul.f32 1.442695, %v1161_v17  ;;  %v1168_v20 = vmul.f32 1.442695, %v1162_v18 }
 0x31e   : > { %v836_v22 = vpop.permute.xlu1 %835 }
 0x31f   : > { %2338 = vpow2.f32 %v1166_v19  ;;  %839 = vst.msk [vmem:[#allocation3 + $0x4] sm:$0xf] %vm821_vm2, %v836_v22 }
 0x320   : > { %2340 = vpow2.f32 %v1168_v20 }
 0x322   : > { %v1159_v23 = vpop.xlane.xlu0 %1158 }
 0x323   : > { %v1163_v24 = vsub.f32 %v1142_v4, %v1159_v23 }
 0x325   : > { %v1170_v25 = vmul.f32 1.442695, %v1163_v24 }
 0x326   : > { %v960_v26 = vld [vmem:[#allocation3 + $0x4] sm:$0xf] }
 0x327   : > { %2342 = vpow2.f32 %v1170_v25  ;;  %v1247_v27 = vsel %vm1199_vm4, %v960_v26, 0 }
 0x328   : > { %2143 = vmatpush3.bf16.msra.mxu0 %v1247_v27 }
 0x329   : > { %2154 = vmatprep.subr.bf16.mxu0 %v2583_v0 }
 0x32c   : > { %v2339_v28 = vpop.eup %2338 }
 0x32d   : > { %v2341_v29 = vpop.eup %2340  ;;  %v1175_v30 = vsel %vm963_vm3, %v2339_v28, 0.0 }
 0x32e   : > { %1176 = vadd.xlane.f32.xlu0 %v1175_v30  ;;  %v1178_v31 = vsel %vm963_vm3, %v2341_v29, 0.0 }
 0x32f   : > { %1179 = vadd.xlane.f32.xlu1 %v1178_v31 }
 0x334   : > { %v2343_v32 = vpop.eup %2342 }
 0x335   : > { %v1181_v33 = vsel %vm963_vm3, %v2343_v32, 0.0 }
 0x336   : > { %1182 = vadd.xlane.f32.xlu0 %v1181_v33 }
 0x340   : > { %855 = vrot.lane.b32.xlu1 %v2900_v21, %s2585_s20  ;;  %s2037_s20 = sshll.u32 %s2568_s30, 7 }
 0x341   : > { %s1839_s18 = scalar_lea.hbm %s3172_s23, %s2037_s20 }
 0x34c   : > { %845 = vrot.lane.b32.xlu0 %v2900_v21, %s2587_s17  ;;  %s1841_s17 = sshll.u32 %s675_s21, 4  ;;  %s1842_s17 = int_to_ptr.vmem [resolvable:$true] %s1841_s17 }
 0x34d   : > { %s2488_s5 = scalar_lea.vmem %s1842_s17, 128 }
 0x34e   : > { %p2489_p1 = scmp.ne.s32.totalorder %s1842_s17, %s2488_s5 }
 0x34f   : > { %v1174_v34 = vpop.xlane.xlu1 %1173 }
 0x350   : > { %2344 = vrcp.f32 %v1174_v34  ;;  %p2490_p13 = pnand %p2489_p1, %p2802_p9 }
 0x352   : > { %p2491_p7 = pneg %p2490_p13 }
 0x35d   : > { %v2345_v35 = vpop.eup %2344 }
 0x35e   : > { %v1188_v36 = vmul.f32 %v2345_v35, %v2337_v13  ;;  %v2018_v35 = vld [vmem:[#allocation13] ss:$0 sm:$0xff] }
 0x360   : > { %v1192_v37 = vpack.c.bf16 %v1188_v36, %v1188_v36 }
 0x362   : > { %2139 = vmatmul.mubr.msk.bf16.vlgmr.msra.gmra.mxu1 %vm963_vm3, %v1192_v37 }
 0x363   : > { %2150 = vmatprep.mubr.msk.bf16.mxu1 %vm2584_vm0, %v2583_v0 }
 0x3b7   : > { %v1177_v38 = vpop.xlane.xlu0 %1176 }
 0x3b8   : > { %v1180_v39 = vpop.xlane.xlu1 %1179  ;;  %2346 = vrcp.f32 %v1177_v38 }
 0x3b9   : > { %2348 = vrcp.f32 %v1180_v39 }
 0x3bc   : > { %v856_v40 = vpop.permute.xlu1 %855 }
 0x3bd   : > { %859 = vst.msk [vmem:[#allocation3 + $0xc] sm:$0xf] %vm821_vm2, %v856_v40 }
 0x3bf   : > { %v1183_v41 = vpop.xlane.xlu0 %1182 }
 0x3c0   : > { %2350 = vrcp.f32 %v1183_v41 }
 0x3c3   : > { %v846_v21 = vpop.permute.xlu0 %845 }
 0x3c4   : > { %849 = vst.msk [vmem:[#allocation3 + $0x8] sm:$0xf] %vm821_vm2, %v846_v21  ;;  %v962_v45 = vld [vmem:[#allocation3 + $0xc] sm:$0xf] }
 0x3c5   : > { %v2347_v42 = vpop.eup %2346  ;;  %v1339_v47 = vsel %vm1199_vm4, %v962_v45, 0 }
 0x3c6   : > { %v1189_v43 = vmul.f32 %v2347_v42, %v2339_v28  ;;  %v2349_v44 = vpop.eup %2348 }
 0x3c7   : > { %v1190_v48 = vmul.f32 %v2349_v44, %v2341_v29 }
 0x3c8   : > { %v1193_v46 = vpack.c.bf16 %v1189_v43, %v1189_v43 }
 0x3c9   : > { %v1194_v53 = vpack.c.bf16 %v1190_v48, %v1190_v48 }
 0x3ca   : > { %2145 = vmatmul.mubr.msk.bf16.vlgmr.msra.gmra.mxu0 %vm963_vm3, %v1193_v46 }
 0x3cb   : > { %2155 = vmatpush3.bf16.msra.mxu0 %v1339_v47  ;;  %v961_v49 = vld [vmem:[#allocation3 + $0x8] sm:$0xf]  ;;  %2156 = vmatprep.mubr.msk.bf16.mxu0 %vm2584_vm0, %v2583_v0 }
 0x3cc   : > { %v1293_v51 = vsel %vm1199_vm4, %v961_v49, 0  ;;  %2166 = vmatprep.subr.bf16.mxu0 %v2583_v0  ;;  %v2326_v49 = vld [vmem:[%s3119_s12 + $0x8] sm:$0xff]  }
 0x3cd   : > { %v2351_v52 = vpop.eup %2350  ;;  %2149 = vmatpush3.bf16.msra.mxu1 %v1293_v51  ;;  %v2329_v51 = vld [vmem:[%s3121_s14 + $0x30] sm:$0xff]  }
 0x3ce   : > { %v1191_v54 = vmul.f32 %v2351_v52, %v2343_v32  ;;  %2160 = vmatprep.subr.bf16.mxu1 %v2583_v0  ;;  %v2330_v52 = vld [vmem:[%s3121_s14 + $0x28] sm:$0xff]  }
 0x3d0   : > { %2151 = vmatmul.mubr.msk.bf16.vlgmr.msra.gmra.mxu1 %vm963_vm3, %v1194_v53  ;;  %v1195_v56 = vpack.c.bf16 %v1191_v54, %v1191_v54  ;;  %v2331_v53 = vld [vmem:[%s3121_s14 + $0x20] sm:$0xff]   ;;  %v2332_v54 = vld [vmem:[%s3121_s14 + $0x18] sm:$0xff]  }
 0x3d1   : > { %2161 = vmatpush3.bf16.msra.mxu1 %v1393_v55  ;;  %2162 = vmatprep.mubr.msk.bf16.mxu1 %vm2584_vm0, %v2583_v0  ;;  %v2333_v55 = vld [vmem:[%s3121_s14 + $0x10] sm:$0xff]  }
 0x3d2   : > { %2157 = vmatmul.mubr.msk.bf16.vlgmr.msra.gmra.mxu0 %vm963_vm3, %v1195_v56  ;;  %2172 = vmatprep.subr.bf16.mxu1 %v2583_v0 }
 0x3d3   : > { %2168 = vmatprep.mubr.msk.bf16.mxu0 %vm2584_vm0, %v2583_v0  ;;  %2167 = vmatpush3.bf16.msra.mxu0 %v1439_v58 }
 0x3d4   : > { %2178 = vmatprep.subr.bf16.mxu0 %v2583_v0 }
 0x422   : > { %v1237_v60 = vpop.f32.mrf.mxu1 }
 0x423   : > { %v1381_v61 = vpack.c.bf16 %v1237_v60, %v1237_v60  ;;  %v2019_v60 = vld [vmem:[%s3117_s10] ss:$0 sm:$0xff] }
 0x424   : > { %v2140_v63 = vpop.f32.mrf.mxu1 }
 0x425   : > { %2163 = vmatmul.mubr.msk.bf16.vlgmr.msra.gmra.mxu1 %vm963_vm3, %v1381_v61 }
 0x426   : > { %v1240_v1 = vpop.f32.mrf.mxu1  ;;  %2173 = vmatpush3.bf16.msra.mxu1 %v1485_v62  ;;  %2174 = vmatprep.mubr.msk.bf16.mxu1 %vm2584_vm0, %v2583_v0  ;;  %v2020_v62 = vld [vmem:[%s3118_s11] ss:$0 sm:$0xff] }
 0x427   : > { %2184 = vmatprep.subr.bf16.mxu1 %v2583_v0 }
 0x428   : > { %v2141_v2 = vpop.f32.mrf.mxu1 }
 0x48a   : > { %v1283_v4 = vpop.f32.mrf.mxu0 }
 0x48b   : > { %v1382_v5 = vpack.c.bf16 %v1283_v4, %v1283_v4  ;;  %v2335_v4 = vld [vmem:[%s3121_s14] sm:$0xff]  }
 0x48c   : > { %v2146_v7 = vpop.f32.mrf.mxu0 }
 0x48d   : > { %2169 = vmatmul.mubr.msk.bf16.vlgmr.msra.gmra.mxu0 %vm963_vm3, %v1382_v5  ;;  %v2021_v5 = vld [vmem:[%s3120_s13] ss:$0 sm:$0xff] }
 0x48e   : > { %v1286_v9 = vpop.f32.mrf.mxu0  ;;  %2179 = vmatpush3.bf16.msra.mxu0 %v1531_v6  ;;  %2180 = vmatprep.mubr.msk.bf16.mxu0 %vm2584_vm0, %v2583_v0 }
 0x48f   : > { %2192 = vmatprep.subr.bf16.mxu0 %v2583_v0 }
 0x490   : > { %v2147_v10 = vpop.f32.mrf.mxu0  ;;  %v1329_v11 = vpop.f32.mrf.mxu1 }
 0x491   : > { %v1383_v12 = vpack.c.bf16 %v1329_v11, %v1329_v11 }
 0x492   : > { %v2152_v13 = vpop.f32.mrf.mxu1  ;;  %v1375_v14 = vpop.f32.mrf.mxu0 }
 0x493   : > { %v1384_v15 = vpack.c.bf16 %v1375_v14, %v1375_v14  ;;  %2175 = vmatmul.mubr.msk.bf16.vlgmr.msra.gmra.mxu1 %vm963_vm3, %v1383_v12 }
 0x494   : > { %v1332_v16 = vpop.f32.mrf.mxu1  ;;  %v2158_v17 = vpop.f32.mrf.mxu0  ;;  %2188 = vmatprep.mubr.msk.bf16.mxu1 %vm2584_vm0, %v2583_v0  ;;  %2185 = vmatpush3.bf16.msra.mxu1 %v2326_v49 }
 0x495   : > { %2181 = vmatmul.mubr.msk.bf16.vlgmr.msra.gmra.mxu0 %vm963_vm3, %v1384_v15  ;;  %2186 = vmatprep.subr.bf16.mxu1 %v2583_v0 }
 0x496   : > { %v2153_v18 = vpop.f32.mrf.mxu1  ;;  %v1378_v19 = vpop.f32.mrf.mxu0  ;;  %2208 = vmatprep.mubr.msk.bf16.mxu0 %vm2584_vm0, %v2583_v0  ;;  %2193 = vmatpush3.bf16.msra.mxu0 %v2328_v50 }
 0x497   : > { %2194 = vmatprep.subr.bf16.mxu0 %v2583_v0 }
 0x498   : > { %v2159_v20 = vpop.f32.mrf.mxu0 }
 0x49a   : > { %2195 = vmatpush3.bf16.msra.mxu0 %v2329_v51 }
 0x49b   : > { %2196 = vmatprep.subr.bf16.mxu0 %v2583_v0 }
 0x49e   : > { %2197 = vmatpush3.bf16.msra.mxu0 %v2330_v52 }
 0x49f   : > { %2198 = vmatprep.subr.bf16.mxu0 %v2583_v0 }
 0x4a2   : > { %2199 = vmatpush3.bf16.msra.mxu0 %v2331_v53 }
 0x4a3   : > { %2200 = vmatprep.subr.bf16.mxu0 %v2583_v0 }
 0x4a6   : > { %2201 = vmatpush3.bf16.msra.mxu0 %v2332_v54 }
 0x4a7   : > { %2202 = vmatprep.subr.bf16.mxu0 %v2583_v0 }
 0x4aa   : > { %2203 = vmatpush3.bf16.msra.mxu0 %v2333_v55 }
 0x4ab   : > { %2204 = vmatprep.subr.bf16.mxu0 %v2583_v0 }
 0x4ae   : > { %2205 = vmatpush3.bf16.msra.mxu0 %v2334_v3 }
 0x4af   : > { %2206 = vmatprep.subr.bf16.mxu0 %v2583_v0  ;;  %v2025_v0 = vld [vmem:[%s3168_s26] ss:$0 sm:$0xff]  ;;  %s1827_s26 = scalar_lea.sflag [#allocation7], %s2832_s3 }
 0x4b2   : > { %2207 = vmatpush3.bf16.msra.mxu0 %v2335_v4 }
 0x4e5   : > { %v1429_v22 = vpop.f32.mrf.mxu1 }
 0x4e7   : > { %v2164_v23 = vpop.f32.mrf.mxu1 }
 0x4e9   : > { %v1432_v24 = vpop.f32.mrf.mxu1 }
 0x4eb   : > { %v2165_v25 = vpop.f32.mrf.mxu1 }
 0x54d   : > { %v1475_v26 = vpop.f32.mrf.mxu0 }
 0x54e   : > { %v1573_v29 = vadd.f32 %v1475_v26, %v1429_v22 }
 0x54f   : > { %v2170_v27 = vpop.f32.mrf.mxu0 }
 0x551   : > { %v1478_v28 = vpop.f32.mrf.mxu0 }
 0x553   : > { %v2171_v30 = vpop.f32.mrf.mxu0  ;;  %v1521_v31 = vpop.f32.mrf.mxu1 }
 0x554   : > { %v1574_v32 = vadd.f32 %v1573_v29, %v1521_v31  ;;  %v2034_v31 = vld [vmem:[%s3170_s9] ss:$0 sm:$0xff]  ;;  %s2492_s9 = sshll.u32 %s2588_s7, 4  ;;  %s2493_s9 = int_to_ptr.vmem [resolvable:$false] %s2492_s9 }
 0x555   : > { %v2176_v33 = vpop.f32.mrf.mxu1  ;;  %v1567_v34 = vpop.f32.mrf.mxu0  ;;  %s2494_s30 = scalar_lea.vmem %s2493_s9, 256  ;;  %p2495_p3 = scmp.lt.s32.totalorder %s1842_s17, %s2493_s9 }
 0x556   : > { %v1575_v36 = vadd.f32 %v1574_v32, %v1567_v34  ;;  %v2035_v33 = vld [vmem:[%s3171_s0] ss:$0 sm:$0xff]  ;;  %p2496_p4 = scmp.lt.s32.totalorder %s2494_s30, %s2488_s5 }
 0x557   : > { %v1524_v37 = vpop.f32.mrf.mxu1  ;;  %v2182_v38 = vpop.f32.mrf.mxu0 }
 0x558   : > { %v1583_v39 = vadd.f32 %v2018_v35, %v1575_v36  ;;  %p2497_p2 = por %p2496_p4, %p2495_p3 }
 0x559   : > { %v2177_v40 = vpop.f32.mrf.mxu1  ;;  %v1570_v41 = vpop.f32.mrf.mxu0 }
 0x55a   : > { %v1584_v21 = vadd.f32 %v1583_v39, %v2887_v8  ;;  %v2327_v8 = vld [vmem:[%s3119_s12] sm:$0xff]   ;;  %p2498_p6 = pnand %p2497_p2, %p2491_p7 }
 0x55b   : > { %v2183_v42 = vpop.f32.mrf.mxu0  ;;  %2187 = vmatpush3.bf16.msra.mxu1 %v2327_v8 }
 0x55c   : > { %v1585_v43 = vsel %vm712_vm1, %v1584_v21, 0.0 }
 0x55d   : > { %1586 = vadd.xlane.f32.xlu1 %v1585_v43 }
 0x5e6   : > { %v1587_v44 = vpop.xlane.xlu1 %1586 }
 0x5e7   : > { %v1589_v45 = vmul.f32 0.03125, %v1587_v44 }
 0x5e9   : > { %v1590_v46 = vsub.f32 %v1584_v21, %v1589_v45 }
 0x5eb   : > { %v1591_v47 = vmul.f32 %v1590_v46, %v1590_v46 }
 0x5ed   : > { %v1592_v48 = vsel %vm712_vm1, %v1591_v47, 0.0 }
 0x5ee   : > { %1593 = vadd.xlane.f32.xlu0 %v1592_v48 }
 0x677   : > { %v1594_v56 = vpop.xlane.xlu0 %1593 }
 0x678   : > { %v1595_v57 = vmul.f32 0.03125, %v1594_v56 }
 0x67a   : > { %v1596_v58 = vadd.f32 1e-05, %v1595_v57 }
 0x67c   : > { %2352 = vrsqrt.f32 %v1596_v58 }
 0x689   : > { %v2353_v59 = vpop.eup %2352 }
 0x68a   : > { %v1598_v61 = vmul.f32 %v2353_v59, %v1590_v46 }
 0x68c   : > { %v1606_v63 = vmul.f32 %v2019_v60, %v1598_v61 }
 0x68e   : > { %v1614_v1 = vadd.f32 %v2020_v62, %v1606_v63 }
 0x690   : > { %v1615_v2 = vpack.c.bf16 %v1614_v1, %v1614_v1 }
 0x692   : > { %2189 = vmatmul.mubr.msk.bf16.vlgmr.msra.gmra.mxu1 %vm712_vm1, %v1615_v2 }
 0x752   : > { %v1676_v6 = vpop.f32.mrf.mxu1 }
 0x753   : > { %v1677_v7 = vadd.f32 %v2021_v5, %v1676_v6 }
 0x754   : > { %v2190_v9 = vpop.f32.mrf.mxu1 }
 0x755   : > { %v1682_v10 = vmax.f32 %v1677_v7, 0.0 }
 0x756   : > { %v1679_v11 = vpop.f32.mrf.mxu1 }
 0x757   : > { %v1683_v12 = vpack.c.bf16 %v1682_v10, %v1682_v10 }
 0x758   : > { %v2191_v13 = vpop.f32.mrf.mxu1 }
 0x759   : > { %2209 = vmatmul.mubr.bf16.vlgmr.msra.gmra.mxu0 %v1683_v12 }
 0x819   : > { %v1789_v14 = vpop.f32.mrf.mxu0 }
 0x81a   : > { %v1790_v15 = vadd.f32 %v2025_v0, %v1789_v14 }
 0x81b   : > { %v2210_v16 = vpop.f32.mrf.mxu0 }
 0x81c   : > { %v1795_v17 = vadd.f32 %v1790_v15, %v1614_v1 }
 0x81d   : > { %v1792_v18 = vpop.f32.mrf.mxu0 }
 0x81e   : > { %v1796_v19 = vsel %vm712_vm1, %v1795_v17, 0.0 }
 0x81f   : > { %1797 = vadd.xlane.f32.xlu0 %v1796_v19  ;;  %v2211_v20 = vpop.f32.mrf.mxu0 }
 0x8a8   : > { %v1798_v22 = vpop.xlane.xlu0 %1797 }
 0x8a9   : > { %v1799_v23 = vmul.f32 0.03125, %v1798_v22 }
 0x8ab   : > { %v1800_v24 = vsub.f32 %v1795_v17, %v1799_v23 }
 0x8ad   : > { %v1801_v25 = vmul.f32 %v1800_v24, %v1800_v24 }
 0x8af   : > { %v1802_v26 = vsel %vm712_vm1, %v1801_v25, 0.0 }
 0x8b0   : > { %1803 = vadd.xlane.f32.xlu1 %v1802_v26 }
 0x939   : > { %v1804_v27 = vpop.xlane.xlu1 %1803 }
 0x93a   : > { %v1805_v28 = vmul.f32 0.03125, %v1804_v27 }
 0x93c   : > { %v1806_v29 = vadd.f32 1e-05, %v1805_v28 }
 0x93e   : > { %2354 = vrsqrt.f32 %v1806_v29 }
 0x94b   : > { %v2355_v30 = vpop.eup %2354 }
 0x94c   : > { %v1808_v32 = vmul.f32 %v2355_v30, %v1800_v24 }
 0x94e   : > { %v1816_v34 = vmul.f32 %v2034_v31, %v1808_v32 }
 0x950   : > { %v1824_v35 = vadd.f32 %v2035_v33, %v1816_v34 }
 0x952   : > { %1825 = vst.msk [vmem:[%s675_s21] sm:$0xff] %vm712_vm1, %v1824_v35 }
 0x953   : > { %2501 = shalt.err (!%p2498_p6)
}
 0x954   : > { %s2502_s24 = scalar_lea.hbm %s1839_s18, 128  ;;  %s2506_s15 = scalar_lea.hbm %s3172_s23, 256 }
 0x955   : > { %p2503_p5 = scmp.ne.s32.totalorder %s1839_s18, %s2502_s24  ;;  %p2507_p12 = scmp.lt.s32.totalorder %s1839_s18, %s3172_s23 }
 0x956   : > { %p2508_p8 = scmp.lt.s32.totalorder %s2506_s15, %s2502_s24 }
 0x957   : > { %p2504_p11 = pnand %p2503_p5, %p2802_p9 }
 0x958   : > { %p2509_p1 = por %p2508_p8, %p2507_p12 }
 0x959   : > { %p2505_p0 = pneg %p2504_p11 }
 0x95b   : > { %p2510_p13 = pnand %p2509_p1, %p2505_p0 }
 0x95d   : > { %2513 = shalt.err (!%p2510_p13)
}
 0x95e   : > { %2230 = dma.vmem_to_hbm [thread:$0]  (%p2802_p9), %s1842_s17, 128, %s1839_s18, %s1827_s26  }
 0x95f PF: > { %s3173_s21 = sld [smem:[#allocation19_spill]]  ;;  %p3174_p7 = scmp.ge.s32.totalorder %s2576_s19, 2 }
 0x961   : > { %p2250_p3 = pnand %p3174_p7, %p2809_p10 }
 0x963   : > { %p2251_p4 = pneg %p2250_p3 }
 0x965   : > { %s1853_s2 = sand.u32 1, %s3173_s21  }
 0x966   : > { %s1854_s22 = scalar_lea.sflag [#allocation7], %s1853_s2 }
 0x967   : > { %2551 = dma.done.wait (%p2251_p4), %s1854_s22, 128  }
 0x968   : > { %2553 = vsyncadd (%p2251_p4), %s1854_s22, 4294967168  ;;  %s36_s19 = sadd.s32 1, %s2576_s19   ;;  %s3175_s5 = sld [smem:[#allocation23_spill]] }
 0x969   : > { %p33_p2 = scmp.ge.s32.totalorder %s36_s19, 4   ;;  %s3176_s30 = sld [smem:[#allocation20_spill]] }
 0x96a   : > { %s3177_s0 = sld [smem:[#allocation21_spill]]  ;;  %s3178_s27 = smov %s2560_s28 }
 0x96b   : > { %s3179_s28 = smov %s2564_s29  ;;  %35 = sbr.rel (!%p33_p2) target bundleno = 20 (0x14), region = 169 }
 0x96e   : > { %s3180_s29 = smov %s3175_s5 }
 0x970   :  { %1859 = vsyncpa [#allocation6], 1 }
 0x971   :  { %1861 = vsyncpa [#allocation6 + $0x1], 1 }
 0x972   :  { %1862 = vsyncpa [#allocation9], 1 }
 0x973   :  { %1863 = vsyncpa [#allocation12], 1 }
 0x974   :  { %1864 = vsyncpa [#allocation7], 1 }
 0x975   :  { %1866 = vsyncpa [#allocation7 + $0x1], 1 }

</bundles_post_ra>
